<compile_context>
chip_gen: v6e
topology: v6e:2x2x1
jax: 0.10.0
libtpu: 0.0.40
codegen_flags: <defaults>
</compile_context>

<pallas_src>
import jax
import jax.numpy as jnp
from jax.experimental import pallas as pl
from jax.experimental.pallas import tpu as pltpu

LANE = 128  # TPU lane width; all feature dims are padded to this.


# ----------------------------- Pallas kernel ------------------------------ #
def generator_mlp_kernel(x_ref,
                         w1_ref, b1_ref,
                         w2_ref, b2_ref,
                         w3_ref, b3_ref,
                         w4_ref, b4_ref,
                         o_ref):
    """Fused 4-layer MLP.  All operands are lane-dense (last dim = 128).
    Matmuls take bf16 operands and accumulate in f32 on the MXU; bias add and
    ReLU run on the VPU in f32, entirely inside VMEM."""
    x = x_ref[...]                                                  # (tile, 128) bf16

    h = jnp.dot(x, w1_ref[...], preferred_element_type=jnp.float32) + b1_ref[...]
    h = jnp.maximum(h, 0.0).astype(w2_ref.dtype)

    h = jnp.dot(h, w2_ref[...], preferred_element_type=jnp.float32) + b2_ref[...]
    h = jnp.maximum(h, 0.0).astype(w3_ref.dtype)

    h = jnp.dot(h, w3_ref[...], preferred_element_type=jnp.float32) + b3_ref[...]
    h = jnp.maximum(h, 0.0).astype(w4_ref.dtype)

    out = jnp.dot(h, w4_ref[...], preferred_element_type=jnp.float32) + b4_ref[...]
    o_ref[...] = out.astype(o_ref.dtype)                            # (tile, 128) f32


# ------------------------------ Wrapper ------------------------------------ #
def _round_up(n, m):
    return ((n + m - 1) // m) * m


def _pad2(a, rows, cols):
    r, c = a.shape
    return jnp.pad(a, ((0, rows - r), (0, cols - c)))


def generator_forward(x, params, *, batch_tile=512, compute_dtype=jnp.bfloat16):
    """x: (B, 16) float32.  params: dict of (W, b) per layer (W as (in, out)).
    Returns (B, 64) float32."""
    B, D_in = x.shape
    assert D_in == 16
    D_out = params["w4"].shape[1]           # 64

    # Tile the batch; pad B up so the tile divides it.  Tile stays a multiple of 8.
    batch_tile = _round_up(min(batch_tile, max(B, 8)), 8)
    B_pad = _round_up(B, batch_tile)
    grid = (B_pad // batch_tile,)

    # Lane-dense, bf16 input: zero-pad batch rows and feature columns to 128.
    x_p = jnp.zeros((B_pad, LANE), compute_dtype).at[:B, :D_in].set(
        x.astype(compute_dtype))

    # Weights zero-padded to (128, 128), cast to the matmul compute dtype.
    w1 = _pad2(params["w1"], LANE, LANE).astype(compute_dtype)
    w2 = _pad2(params["w2"], LANE, LANE).astype(compute_dtype)
    w3 = _pad2(params["w3"], LANE, LANE).astype(compute_dtype)
    w4 = _pad2(params["w4"], LANE, LANE).astype(compute_dtype)

    # Biases: zero-pad to 128 lanes and pre-broadcast to a full (tile, 128) f32 slab
    # (avoids a per-grid-step broadcast_in_dim inside the kernel).
    def bias_slab(b):
        return jnp.broadcast_to(_pad2(b, 1, LANE), (batch_tile, LANE)).astype(jnp.float32)

    b1 = bias_slab(params["b1"])
    b2 = bias_slab(params["b2"])
    b3 = bias_slab(params["b3"])
    b4 = bias_slab(params["b4"])

    # Full-extent blocks with constant index_map -> resident in VMEM, no re-DMA.
    def resident(shape):
        return pl.BlockSpec(shape, lambda i: (0, 0))

    out_padded = pl.pallas_call(
        generator_mlp_kernel,
        out_shape=jax.ShapeDtypeStruct((B_pad, LANE), jnp.float32),
        grid_spec=pltpu.PrefetchScalarGridSpec(
            num_scalar_prefetch=0,
            grid=grid,
            in_specs=[
                pl.BlockSpec((batch_tile, LANE), lambda i: (i, 0)),   # x tile
                resident(w1.shape), resident(b1.shape),
                resident(w2.shape), resident(b2.shape),
                resident(w3.shape), resident(b3.shape),
                resident(w4.shape), resident(b4.shape),
            ],
            out_specs=pl.BlockSpec((batch_tile, LANE), lambda i: (i, 0)),
        ),
        compiler_params=pltpu.CompilerParams(
            dimension_semantics=("parallel",),   # >=2 steps -> v7x megacore sharding
        ),
    )(x_p, w1, b1, w2, b2, w3, b3, w4, b4)

    # Slice padded batch rows and padded output lanes back to the logical shape.
    return out_padded[:B, :D_out]


# --------------------------- Parameter init -------------------------------- #
def init_params(key):
    """Deterministic init mimicking PyTorch nn.Linear default:
    U(-1/sqrt(fan_in), 1/sqrt(fan_in)) for both weight and bias.
    Weights stored as (in_features, out_features)."""
    dims = [(16, 32), (32, 64), (64, 128), (128, 64)]
    params = {}
    for idx, (fan_in, fan_out) in enumerate(dims, start=1):
        key, kw, kb = jax.random.split(key, 3)
        bound = 1.0 / jnp.sqrt(jnp.float32(fan_in))
        params[f"w{idx}"] = jax.random.uniform(kw, (fan_in, fan_out), jnp.float32,
                                               -bound, bound)
        params[f"b{idx}"] = jax.random.uniform(kb, (1, fan_out), jnp.float32,
                                               -bound, bound)
    return params


def reference_forward(x, params, compute_dtype=jnp.float32):
    """Plain-JAX reference.  With compute_dtype=bfloat16 it applies the same
    operand casting as the kernel (f32 accumulation), giving a tight check."""
    h = x
    for i in range(1, 5):
        w = params[f"w{i}"].astype(compute_dtype)
        b = params[f"b{i}"]
        h = jnp.dot(h.astype(compute_dtype), w,
                    preferred_element_type=jnp.float32) + b
        if i < 4:
            h = jnp.maximum(h, 0.0)
    return h


# -------------------------------- Main -------------------------------------- #
if __name__ == "__main__":
    key = jax.random.PRNGKey(0)
    key, kx = jax.random.split(key)

    B = 1024                  # 2 grid steps of 512 -> both v7x TensorCores used
    x = jax.random.normal(kx, (B, 16), jnp.float32)
    params = init_params(key)

    out = generator_forward(x, params, batch_tile=512)
    out = jax.block_until_ready(out)
    assert out.shape == (B, 64)

    # Tight check vs a reference that applies the same bf16 operand casting.
    ref_matched = reference_forward(x, params, compute_dtype=jnp.bfloat16)
    assert jnp.allclose(out, ref_matched, atol=2e-3, rtol=2e-3), \
        "mismatch vs bf16-matched reference"

    # Loose check vs the full-precision reference (bf16 matmul inputs => relaxed tol).
    ref_f32 = reference_forward(x, params, compute_dtype=jnp.float32)
    assert jnp.allclose(out, ref_f32, atol=1e-1, rtol=1e-1), \
        "mismatch vs f32 reference"

    print("KERNEL_OK")
</pallas_src>

<mosaic_0001>
module attributes {stable_mosaic.version = 11 : i64} {
  func.func @generator_mlp_kernel(%arg0: i32, %arg1: memref<512x128xbf16, #tpu.memory_space<vmem>>, %arg2: memref<128x128xbf16, #tpu.memory_space<vmem>>, %arg3: memref<512x128xf32, #tpu.memory_space<vmem>>, %arg4: memref<128x128xbf16, #tpu.memory_space<vmem>>, %arg5: memref<512x128xf32, #tpu.memory_space<vmem>>, %arg6: memref<128x128xbf16, #tpu.memory_space<vmem>>, %arg7: memref<512x128xf32, #tpu.memory_space<vmem>>, %arg8: memref<128x128xbf16, #tpu.memory_space<vmem>>, %arg9: memref<512x128xf32, #tpu.memory_space<vmem>>, %arg10: memref<512x128xf32, #tpu.memory_space<vmem>>) attributes {dimension_semantics = [#tpu.dimension_semantics<parallel>], iteration_bounds = array<i64: 2>, scalar_prefetch = 0 : i64, scratch_operands = 0 : i64, tpu.core_type = #tpu.core_type<tc>, window_params = [{transform_indices = @transform_0, window_bounds = array<i64: 512, 128>}, {pipeline_mode = #tpu.pipeline_mode<synchronous>, transform_indices = @transform_1, window_bounds = array<i64: 128, 128>}, {pipeline_mode = #tpu.pipeline_mode<synchronous>, transform_indices = @transform_2, window_bounds = array<i64: 512, 128>}, {pipeline_mode = #tpu.pipeline_mode<synchronous>, transform_indices = @transform_3, window_bounds = array<i64: 128, 128>}, {pipeline_mode = #tpu.pipeline_mode<synchronous>, transform_indices = @transform_4, window_bounds = array<i64: 512, 128>}, {pipeline_mode = #tpu.pipeline_mode<synchronous>, transform_indices = @transform_5, window_bounds = array<i64: 128, 128>}, {pipeline_mode = #tpu.pipeline_mode<synchronous>, transform_indices = @transform_6, window_bounds = array<i64: 512, 128>}, {pipeline_mode = #tpu.pipeline_mode<synchronous>, transform_indices = @transform_7, window_bounds = array<i64: 128, 128>}, {pipeline_mode = #tpu.pipeline_mode<synchronous>, transform_indices = @transform_8, window_bounds = array<i64: 512, 128>}, {transform_indices = @transform_9, window_bounds = array<i64: 512, 128>}]} {
    %c0 = arith.constant 0 : index
    %c0_0 = arith.constant 0 : index
    %0 = vector.load %arg1[%c0, %c0_0] : memref<512x128xbf16, #tpu.memory_space<vmem>>, vector<512x128xbf16>
    %c0_1 = arith.constant 0 : index
    %c0_2 = arith.constant 0 : index
    %1 = vector.load %arg2[%c0_1, %c0_2] : memref<128x128xbf16, #tpu.memory_space<vmem>>, vector<128x128xbf16>
    %cst = arith.constant dense<0.000000e+00> : vector<512x128xf32>
    %2 = tpu.matmul %0, %1, %cst {dimension_numbers = #tpu.dot_dimension_numbers<[1], [0], [0], [1], [0, 0, 1, 1], [], []>} : vector<512x128xbf16>, vector<128x128xbf16>, vector<512x128xf32> -> vector<512x128xf32>
    %c0_3 = arith.constant 0 : index
    %c0_4 = arith.constant 0 : index
    %3 = vector.load %arg3[%c0_3, %c0_4] : memref<512x128xf32, #tpu.memory_space<vmem>>, vector<512x128xf32>
    %4 = arith.addf %2, %3 : vector<512x128xf32>
    %cst_5 = arith.constant 0.000000e+00 : f32
    %5 = vector.broadcast %cst_5 : f32 to vector<512x128xf32>
    %6 = arith.maximumf %4, %5 : vector<512x128xf32>
    %7 = arith.truncf %6 : vector<512x128xf32> to vector<512x128xbf16>
    %c0_6 = arith.constant 0 : index
    %c0_7 = arith.constant 0 : index
    %8 = vector.load %arg4[%c0_6, %c0_7] : memref<128x128xbf16, #tpu.memory_space<vmem>>, vector<128x128xbf16>
    %cst_8 = arith.constant dense<0.000000e+00> : vector<512x128xf32>
    %9 = tpu.matmul %7, %8, %cst_8 {dimension_numbers = #tpu.dot_dimension_numbers<[1], [0], [0], [1], [0, 0, 1, 1], [], []>} : vector<512x128xbf16>, vector<128x128xbf16>, vector<512x128xf32> -> vector<512x128xf32>
    %c0_9 = arith.constant 0 : index
    %c0_10 = arith.constant 0 : index
    %10 = vector.load %arg5[%c0_9, %c0_10] : memref<512x128xf32, #tpu.memory_space<vmem>>, vector<512x128xf32>
    %11 = arith.addf %9, %10 : vector<512x128xf32>
    %cst_11 = arith.constant 0.000000e+00 : f32
    %12 = vector.broadcast %cst_11 : f32 to vector<512x128xf32>
    %13 = arith.maximumf %11, %12 : vector<512x128xf32>
    %14 = arith.truncf %13 : vector<512x128xf32> to vector<512x128xbf16>
    %c0_12 = arith.constant 0 : index
    %c0_13 = arith.constant 0 : index
    %15 = vector.load %arg6[%c0_12, %c0_13] : memref<128x128xbf16, #tpu.memory_space<vmem>>, vector<128x128xbf16>
    %cst_14 = arith.constant dense<0.000000e+00> : vector<512x128xf32>
    %16 = tpu.matmul %14, %15, %cst_14 {dimension_numbers = #tpu.dot_dimension_numbers<[1], [0], [0], [1], [0, 0, 1, 1], [], []>} : vector<512x128xbf16>, vector<128x128xbf16>, vector<512x128xf32> -> vector<512x128xf32>
    %c0_15 = arith.constant 0 : index
    %c0_16 = arith.constant 0 : index
    %17 = vector.load %arg7[%c0_15, %c0_16] : memref<512x128xf32, #tpu.memory_space<vmem>>, vector<512x128xf32>
    %18 = arith.addf %16, %17 : vector<512x128xf32>
    %cst_17 = arith.constant 0.000000e+00 : f32
    %19 = vector.broadcast %cst_17 : f32 to vector<512x128xf32>
    %20 = arith.maximumf %18, %19 : vector<512x128xf32>
    %21 = arith.truncf %20 : vector<512x128xf32> to vector<512x128xbf16>
    %c0_18 = arith.constant 0 : index
    %c0_19 = arith.constant 0 : index
    %22 = vector.load %arg8[%c0_18, %c0_19] : memref<128x128xbf16, #tpu.memory_space<vmem>>, vector<128x128xbf16>
    %cst_20 = arith.constant dense<0.000000e+00> : vector<512x128xf32>
    %23 = tpu.matmul %21, %22, %cst_20 {dimension_numbers = #tpu.dot_dimension_numbers<[1], [0], [0], [1], [0, 0, 1, 1], [], []>} : vector<512x128xbf16>, vector<128x128xbf16>, vector<512x128xf32> -> vector<512x128xf32>
    %c0_21 = arith.constant 0 : index
    %c0_22 = arith.constant 0 : index
    %24 = vector.load %arg9[%c0_21, %c0_22] : memref<512x128xf32, #tpu.memory_space<vmem>>, vector<512x128xf32>
    %25 = arith.addf %23, %24 : vector<512x128xf32>
    %c0_23 = arith.constant 0 : index
    %c0_24 = arith.constant 0 : index
    %26 = vector.load %arg10[%c0_23, %c0_24] : memref<512x128xf32, #tpu.memory_space<vmem>>, vector<512x128xf32>
    tpu.vector_store %arg10[%c0_23, %c0_24], %25 {strides = array<i32>} : memref<512x128xf32, #tpu.memory_space<vmem>>, vector<512x128xf32>,
    return
  }
  func.func @transform_0(%arg0: i32) -> (i32, i32) {
    %c0_i32 = arith.constant 0 : i32
    %c0_i32_0 = arith.constant 0 : i32
    return %arg0, %c0_i32 : i32, i32
  }
  func.func @transform_1(%arg0: i32) -> (i32, i32) {
    %c0_i32 = arith.constant 0 : i32
    %c0_i32_0 = arith.constant 0 : i32
    %c0_i32_1 = arith.constant 0 : i32
    return %c0_i32, %c0_i32_0 : i32, i32
  }
  func.func @transform_2(%arg0: i32) -> (i32, i32) {
    %c0_i32 = arith.constant 0 : i32
    %c0_i32_0 = arith.constant 0 : i32
    %c0_i32_1 = arith.constant 0 : i32
    return %c0_i32, %c0_i32_0 : i32, i32
  }
  func.func @transform_3(%arg0: i32) -> (i32, i32) {
    %c0_i32 = arith.constant 0 : i32
    %c0_i32_0 = arith.constant 0 : i32
    %c0_i32_1 = arith.constant 0 : i32
    return %c0_i32, %c0_i32_0 : i32, i32
  }
  func.func @transform_4(%arg0: i32) -> (i32, i32) {
    %c0_i32 = arith.constant 0 : i32
    %c0_i32_0 = arith.constant 0 : i32
    %c0_i32_1 = arith.constant 0 : i32
    return %c0_i32, %c0_i32_0 : i32, i32
  }
  func.func @transform_5(%arg0: i32) -> (i32, i32) {
    %c0_i32 = arith.constant 0 : i32
    %c0_i32_0 = arith.constant 0 : i32
    %c0_i32_1 = arith.constant 0 : i32
    return %c0_i32, %c0_i32_0 : i32, i32
  }
  func.func @transform_6(%arg0: i32) -> (i32, i32) {
    %c0_i32 = arith.constant 0 : i32
    %c0_i32_0 = arith.constant 0 : i32
    %c0_i32_1 = arith.constant 0 : i32
    return %c0_i32, %c0_i32_0 : i32, i32
  }
  func.func @transform_7(%arg0: i32) -> (i32, i32) {
    %c0_i32 = arith.constant 0 : i32
    %c0_i32_0 = arith.constant 0 : i32
    %c0_i32_1 = arith.constant 0 : i32
    return %c0_i32, %c0_i32_0 : i32, i32
  }
  func.func @transform_8(%arg0: i32) -> (i32, i32) {
    %c0_i32 = arith.constant 0 : i32
    %c0_i32_0 = arith.constant 0 : i32
    %c0_i32_1 = arith.constant 0 : i32
    return %c0_i32, %c0_i32_0 : i32, i32
  }
  func.func @transform_9(%arg0: i32) -> (i32, i32) {
    %c0_i32 = arith.constant 0 : i32
    %c0_i32_0 = arith.constant 0 : i32
    return %arg0, %c0_i32 : i32, i32
  }
}

</mosaic_0001>

<bundles_post_ra>
// kernel: tpu_custom_call.1
= control target key start
LH: loop header
LB: loop body
LE: loop exit
PB: predicated region body
PF: predicated region fallthrough
CT: control target
= control target key end

     0   :  { %s4457_s0 = inlined_call_operand.hbm [shape: bf16[1024,128], index: 0, kind: input, shape index: {}]   ;;  %s4458_s1 = inlined_call_operand.hbm [shape: bf16[128,128], index: 1, kind: input, shape index: {}]   ;;  %s4459_s2 = inlined_call_operand.hbm [shape: f32[512,128], index: 2, kind: input, shape index: {}]   ;;  %s4460_s3 = inlined_call_operand.hbm [shape: bf16[128,128], index: 3, kind: input, shape index: {}]   ;;  %s4461_s4 = inlined_call_operand.hbm [shape: f32[512,128], index: 4, kind: input, shape index: {}]   ;;  %s4462_s5 = inlined_call_operand.hbm [shape: bf16[128,128], index: 5, kind: input, shape index: {}]   ;;  %s4463_s6 = inlined_call_operand.hbm [shape: f32[512,128], index: 6, kind: input, shape index: {}]   ;;  %s4464_s7 = inlined_call_operand.hbm [shape: bf16[128,128], index: 7, kind: input, shape index: {}]   ;;  %s4465_s8 = inlined_call_operand.hbm [shape: f32[512,128], index: 8, kind: input, shape index: {}]   ;;  %s4466_s9 = inlined_call_operand.hbm [shape: f32[1024,128], index: 9, kind: output, shape index: {}]  }
   0x1   :  { %4473 = sst [smem:[#allocation24_spill]] %s4458_s1 }
   0x2   :  { %4474 = sst [smem:[#allocation25_spill]] %s4459_s2 }
   0x3   :  { %4475 = sst [smem:[#allocation26_spill]] %s4460_s3 }
   0x4   :  { %14 = vsyncpa [#allocation3], 0 }
   0x5   :  { %16 = vsyncpa [#allocation3 + $0x1], 0 }
   0x6   :  { %17 = vsyncpa [#allocation6], 0 }
   0x7   :  { %18 = vsyncpa [#allocation9], 0 }
   0x8   :  { %19 = vsyncpa [#allocation12], 0 }
   0x9   :  { %20 = vsyncpa [#allocation15], 0 }
   0xa   :  { %21 = vsyncpa [#allocation4], 0 }
   0xb   :  { %23 = vsyncpa [#allocation4 + $0x1], 0  ;;  %s4066_s30 = smov 0   ;;  %s4068_s10 = smov 0  }
   0xc   :  { %s4070_s11 = smov 0   ;;  %s4072_s12 = smov 0  }
   0xd LB: > { %s4000_s13 = smov [#allocation5]   ;;  %s4087_s15 = sadd.s32 4294967295, %s3998_s12   ;;  %s3998_s12 = sphi %s4072_s12, %s4505_s12   ;;  %s3994_s11 = sphi %s4070_s11, %s4504_s11   ;;  %s3990_s10 = sphi %s4068_s10, %s4503_s10   ;;  %s3986_s30 = sphi %s4066_s30, %s4502_s30  }
   0xe   : > { %s266_s14 = sshll.u32 %s4000_s13, 4  ;;  %p2910_p0 = scmp.ge.s32.totalorder %s3998_s12, 1  ;;  %s267_s14 = int_to_ptr.vmem [resolvable:$true] %s266_s14 }
   0xf   : > { %p4469_p1 = scmp.eq.s32.totalorder %s4087_s15, 0  ;;  %p254_p2 = scmp.lt.s32.totalorder %s3998_s12, 3 }
  0x10   : > { %s4001_s17 = smov [#allocation8]   ;;  %s4002_s20 = smov [#allocation11]  }
  0x11   : > { %p4092_p3 = pnand %p2910_p0, %p254_p2  ;;  %s292_s18 = sshll.u32 %s4001_s17, 4  ;;  %s4105_s18 = int_to_ptr.vmem [resolvable:$true] %s292_s18 }
  0x12   : > { %s318_s21 = sshll.u32 %s4002_s20, 4  ;;  %s3693_s23 = scalar_lea.vmem %s267_s14, 1024  ;;  %s4107_s21 = int_to_ptr.vmem [resolvable:$true] %s318_s21 }
  0x13   : > { %s4476_s16 = scalar_select %p4092_p3, 1, 0 }
  0x14   : > { %p3521_p5 = pneg %p4092_p3  ;;  %p3694_p8 = scmp.ne.s32.totalorder %s267_s14, %s3693_s23 }
  0x15   : > { %p3701_p11 = scmp.lt.s32.totalorder %s267_s14, %s267_s14  ;;  %p3702_p12 = scmp.lt.s32.totalorder %s3693_s23, %s3693_s23 }
  0x16   : > { %p4101_p6 = pnand %p3521_p5, %p4469_p1 }
  0x17   : > { %p3703_p13 = por %p3702_p12, %p3701_p11 }
  0x18   : > { %p4111_p7 = pneg %p4101_p6 }
  0x1a   : > { %p3696_p9 = pnand %p3694_p8, %p4111_p7 }
  0x1c   : > { %p3697_p10 = pneg %p3696_p9 }
  0x1e   : > { %p3704_p0 = pnand %p3703_p13, %p3697_p10 }
  0x20   : > { %3707 = shalt.err (!%p3704_p0)
}
  0x21   : > { %s4467_s24 = smov 64   ;;  %s4468_s25 = smov 4  }
  0x22   : > { %s4479_s1 = sld [smem:[#allocation24_spill]]  ;;  %s3719_s28 = scalar_lea.vmem %s4105_s18, 1024 }
  0x23   : > { %p3720_p2 = scmp.ne.s32.totalorder %s4105_s18, %s3719_s28  ;;  %p3727_p9 = scmp.lt.s32.totalorder %s4105_s18, %s4105_s18 }
  0x24   : > { %p3728_p10 = scmp.lt.s32.totalorder %s3719_s28, %s3719_s28 }
  0x25   : > { %p3722_p5 = pnand %p3720_p2, %p4111_p7 }
  0x26   : > { %p3729_p11 = por %p3728_p10, %p3727_p9 }
  0x27   : > { %p3723_p8 = pneg %p3722_p5 }
  0x28   : > { %3524 = dma.hbm_to_vmem [thread:$0]  (!%p4101_p6), %s4479_s1, 1024, %s267_s14, [#allocation6], %s4467_s24, %s4467_s24, %s4468_s25  }
  0x29   : > { %p3730_p12 = pnand %p3729_p11, %p3723_p8 }
  0x2b   : > { %3733 = shalt.err (!%p3730_p12)
}
  0x2c   : > { %s4480_s3 = sld [smem:[#allocation26_spill]]  ;;  %s3745_s14 = scalar_lea.vmem %s4107_s21, 1024 }
  0x2d   : > { %p3746_p13 = scmp.ne.s32.totalorder %s4107_s21, %s3745_s14  ;;  %p3753_p5 = scmp.lt.s32.totalorder %s4107_s21, %s4107_s21 }
  0x2e   : > { %p3754_p8 = scmp.lt.s32.totalorder %s3745_s14, %s3745_s14 }
  0x2f   : > { %p3748_p0 = pnand %p3746_p13, %p4111_p7 }
  0x30   : > { %p3755_p9 = por %p3754_p8, %p3753_p5 }
  0x31   : > { %p3749_p2 = pneg %p3748_p0 }
  0x32   : > { %3530 = dma.hbm_to_vmem [thread:$0]  (!%p4101_p6), %s4480_s3, 1024, %s4105_s18, [#allocation9], %s4467_s24, %s4467_s24, %s4468_s25  }
  0x33   : > { %p3756_p10 = pnand %p3755_p9, %p3749_p2 }
  0x35   : > { %3759 = shalt.err (!%p3756_p10)
}
  0x36   : > { %3536 = dma.hbm_to_vmem [thread:$0]  (!%p4101_p6), %s4462_s5, 1024, %s4107_s21, [#allocation12], %s4467_s24, %s4467_s24, %s4468_s25  }
  0x37   : > { %s4005_s18 = smov [#allocation14]   ;;  %s4006_s26 = smov [#allocation7]  }
  0x38   : > { %s344_s23 = sshll.u32 %s4005_s18, 4  ;;  %s279_s27 = sshll.u32 %s4006_s26, 4  ;;  %s345_s23 = int_to_ptr.vmem [resolvable:$true] %s344_s23  ;;  %s280_s27 = int_to_ptr.vmem [resolvable:$true] %s279_s27 }
  0x39   : > { %s3771_s28 = scalar_lea.vmem %s345_s23, 1024  ;;  %p3779_p0 = scmp.lt.s32.totalorder %s345_s23, %s345_s23 }
  0x3a   : > { %p3772_p11 = scmp.ne.s32.totalorder %s345_s23, %s3771_s28  ;;  %p3780_p2 = scmp.lt.s32.totalorder %s3771_s28, %s3771_s28 }
  0x3c   : > { %p3774_p12 = pnand %p3772_p11, %p4111_p7  ;;  %p3781_p5 = por %p3780_p2, %p3779_p0 }
  0x3e   : > { %p3775_p13 = pneg %p3774_p12 }
  0x40   : > { %p3782_p8 = pnand %p3781_p5, %p3775_p13 }
  0x42   : > { %3785 = shalt.err (!%p3782_p8)
}
  0x43   : > { %3542 = dma.hbm_to_vmem [thread:$0]  (!%p4101_p6), %s4464_s7, 1024, %s345_s23, [#allocation15], %s4467_s24, %s4467_s24, %s4468_s25  }
  0x44   : > { %s3797_s13 = scalar_lea.vmem %s280_s27, 8192  ;;  %p3805_p12 = scmp.lt.s32.totalorder %s280_s27, %s280_s27 }
  0x45   : > { %p3798_p9 = scmp.ne.s32.totalorder %s280_s27, %s3797_s13  ;;  %p3806_p0 = scmp.lt.s32.totalorder %s3797_s13, %s3797_s13 }
  0x47   : > { %p3800_p10 = pnand %p3798_p9, %p4111_p7  ;;  %p3807_p13 = por %p3806_p0, %p3805_p12 }
  0x49   : > { %p3801_p11 = pneg %p3800_p10 }
  0x4b   : > { %p3808_p2 = pnand %p3807_p13, %p3801_p11 }
  0x4d   : > { %3811 = shalt.err (!%p3808_p2)
}
  0x4e   : > { %s4007_s14 = smov 128   ;;  %s4008_s17 = smov 8  }
  0x4f   : > { %s4481_s2 = sld [smem:[#allocation25_spill]]  ;;  %s4009_s23 = smov [#allocation10]  }
  0x50   : > { %s305_s26 = sshll.u32 %s4009_s23, 4  ;;  %s4010_s28 = smov [#allocation13]   ;;  %s306_s26 = int_to_ptr.vmem [resolvable:$true] %s305_s26 }
  0x51   : > { %s331_s21 = sshll.u32 %s4010_s28, 4  ;;  %s3823_s29 = scalar_lea.vmem %s306_s26, 8192  ;;  %s332_s21 = int_to_ptr.vmem [resolvable:$true] %s331_s21 }
  0x52   : > { %p3824_p5 = scmp.ne.s32.totalorder %s306_s26, %s3823_s29  ;;  %p3831_p10 = scmp.lt.s32.totalorder %s306_s26, %s306_s26 }
  0x53   : > { %p3832_p11 = scmp.lt.s32.totalorder %s3823_s29, %s3823_s29 }
  0x54   : > { %p3826_p8 = pnand %p3824_p5, %p4111_p7 }
  0x55   : > { %3527 = dma.hbm_to_vmem [thread:$0]  (!%p4101_p6), %s4481_s2, 8192, %s280_s27, [#allocation6], %s4007_s14, %s4007_s14, %s4008_s17  }
  0x56   : > { %p3827_p9 = pneg %p3826_p8  ;;  %p3833_p12 = por %p3832_p11, %p3831_p10 }
  0x58   : > { %p3834_p0 = pnand %p3833_p12, %p3827_p9 }
  0x5a   : > { %3837 = shalt.err (!%p3834_p0)
}
  0x5b   : > { %3533 = dma.hbm_to_vmem [thread:$0]  (!%p4101_p6), %s4461_s4, 8192, %s306_s26, [#allocation9], %s4007_s14, %s4007_s14, %s4008_s17  }
  0x5c   : > { %s3849_s20 = scalar_lea.vmem %s332_s21, 8192  ;;  %p3857_p8 = scmp.lt.s32.totalorder %s332_s21, %s332_s21 }
  0x5d   : > { %p3850_p13 = scmp.ne.s32.totalorder %s332_s21, %s3849_s20  ;;  %p3858_p10 = scmp.lt.s32.totalorder %s3849_s20, %s3849_s20 }
  0x5f   : > { %p3852_p2 = pnand %p3850_p13, %p4111_p7  ;;  %p3859_p9 = por %p3858_p10, %p3857_p8 }
  0x61   : > { %p3853_p5 = pneg %p3852_p2 }
  0x63   : > { %p3860_p11 = pnand %p3859_p9, %p3853_p5 }
  0x65   : > { %3863 = shalt.err (!%p3860_p11)
}
  0x66   : > { %3539 = dma.hbm_to_vmem [thread:$0]  (!%p4101_p6), %s4463_s6, 8192, %s332_s21, [#allocation12], %s4007_s14, %s4007_s14, %s4008_s17  }
  0x67   : > { %s4011_s26 = smov [#allocation16]  }
  0x68   : > { %s357_s28 = sshll.u32 %s4011_s26, 4  ;;  %s358_s28 = int_to_ptr.vmem [resolvable:$true] %s357_s28 }
  0x69   : > { %s3875_s29 = scalar_lea.vmem %s358_s28, 8192  ;;  %p3883_p2 = scmp.lt.s32.totalorder %s358_s28, %s358_s28 }
  0x6a   : > { %p3876_p12 = scmp.ne.s32.totalorder %s358_s28, %s3875_s29  ;;  %p3884_p5 = scmp.lt.s32.totalorder %s3875_s29, %s3875_s29 }
  0x6c   : > { %p3878_p0 = pnand %p3876_p12, %p4111_p7  ;;  %p3885_p8 = por %p3884_p5, %p3883_p2 }
  0x6e   : > { %p3879_p13 = pneg %p3878_p0 }
  0x70   : > { %p3886_p10 = pnand %p3885_p8, %p3879_p13 }
  0x72   : > { %3889 = shalt.err (!%p3886_p10)
}
  0x73   : > { %3545 = dma.hbm_to_vmem [thread:$0]  (!%p4101_p6), %s4465_s8, 8192, %s358_s28, [#allocation15], %s4007_s14, %s4007_s14, %s4008_s17  }
  0x74   : > { %s2909_s19 = sadd.s32 4294967294, %s3998_s12   ;;  %s4207_s22 = sadd.s32 1, %s3998_s12  }
  0x75   : > { %s33_s13 = ssub.s32 %s3998_s12, %s4207_s22  ;;  %s36_s20 = sadd.s32 1, %s3994_s11 }
  0x76   : > { %p34_p7 = scmp.eq.s32.totalorder %s33_s13, 0  ;;  %p43_p9 = scmp.ne.s32.totalorder %s3994_s11, %s3990_s10 }
  0x77   : > { %p44_p11 = scmp.eq.s32.totalorder %s3998_s12, 0  ;;  %p49_p12 = scmp.ne.s32.totalorder %s3990_s10, %s3986_s30 }
  0x78   : > { %s4218_s18 = scalar_select %p34_p7, %s3994_s11, %s36_s20  }
  0x79   : > { %p4220_p0 = por %p44_p11, %p43_p9  ;;  %p4226_p6 = por %p4469_p1, %p49_p12 }
  0x7a   : > { %p241_p13 = scmp.eq.s32.totalorder %s4087_s15, 1  ;;  %p247_p2 = scmp.eq.s32.totalorder %s2909_s19, 1 }
  0x7b   : > { %s4483_s14 = scalar_select %p4226_p6, 1, 0 }
  0x7c   : > { %p3562_p5 = scmp.lt.s32.totalorder %s3998_s12, 2  ;;  %s371_s17 = sand.u32 1, %s3994_s11  }
  0x7d   : > { %p4233_p8 = por %p241_p13, %p43_p9  ;;  %p4237_p10 = por %p247_p2, %p49_p12 }
  0x7e   : > { %s2920_s29 = sshll.u32 %s371_s17, 8  ;;  %s3003_s27 = sshll.u32 %s3998_s12, 12 }
  0x7f   : > { %s4484_s26 = scalar_select %p4233_p8, 1, 0 }
  0x80   : > { %s4485_s28 = scalar_select %p4237_p10, 1, 0 }
  0x81   : > { %s4245_s20 = scalar_lea.hbm %s4457_s0, %s3003_s27  ;;  %s375_s19 = scalar_lea.vmem [#allocation2], %s2920_s29 }
  0x82   : > { %s382_s24 = sshll.u32 %s375_s19, 4  ;;  %p4251_p7 = pnand %p3562_p5, %p4220_p0  ;;  %s4247_s24 = int_to_ptr.vmem [resolvable:$true] %s382_s24 }
  0x83   : > { %s4255_s1 = scalar_lea.sflag [#allocation3], %s371_s17  ;;  %s3890_s2 = scalar_lea.hbm %s4245_s20, 4096 }
  0x84   : > { %p3891_p9 = scmp.ne.s32.totalorder %s4245_s20, %s3890_s2  ;;  %p3892_p11 = pneg %p4251_p7 }
  0x85   : > { %s3895_s29 = scalar_lea.hbm %s4457_s0, 8192  ;;  %p3896_p0 = scmp.lt.s32.totalorder %s4245_s20, %s4457_s0 }
  0x86   : > { %p3893_p12 = pnand %p3892_p11, %p3891_p9  ;;  %p3897_p2 = scmp.lt.s32.totalorder %s3895_s29, %s3890_s2 }
  0x88   : > { %p3894_p13 = pneg %p3893_p12  ;;  %p3898_p5 = por %p3897_p2, %p3896_p0 }
  0x8a   : > { %p3899_p4 = pnand %p3898_p5, %p3894_p13 }
  0x8c   : > { %3902 = shalt.err (!%p3899_p4)
}
  0x8d   : > { %s3903_s23 = scalar_lea.vmem %s4247_s24, 4096  ;;  %s4012_s17 = smov [#allocation2]  }
  0x8e   : > { %p3904_p1 = scmp.ne.s32.totalorder %s4247_s24, %s3903_s23  ;;  %s3908_s3 = sshll.u32 %s4012_s17, 4  ;;  %s3909_s3 = int_to_ptr.vmem [resolvable:$false] %s3908_s3 }
  0x8f   : > { %s3910_s27 = scalar_lea.vmem %s3909_s3, 8192  ;;  %p3911_p12 = scmp.lt.s32.totalorder %s4247_s24, %s3909_s3 }
  0x90   : > { %p3906_p10 = pnand %p3904_p1, %p3892_p11  ;;  %p3912_p8 = scmp.lt.s32.totalorder %s3910_s27, %s3903_s23 }
  0x92   : > { %p3907_p9 = pneg %p3906_p10  ;;  %p3913_p6 = por %p3912_p8, %p3911_p12 }
  0x94   : > { %p3914_p3 = pnand %p3913_p6, %p3907_p9 }
  0x96   : > { %3917 = shalt.err (!%p3914_p3)
}
  0x97   : > { %s4487_s2 = smov 4   ;;  %s4488_s21 = smov 64  }
  0x98   : > { %3549 = dma.hbm_to_vmem [thread:$0]  (!%p4251_p7), %s4245_s20, 4096, %s4247_s24, %s4255_s1, %s4488_s21, %s4488_s21, %s4487_s2  }
  0x99   : > { %p4489_p1 = scmp.ne.s32.totalorder %s4476_s16, 0 }
  0x9a   : > { %s4282_s29 = sand.u32 (!%p4489_p1), 1, %s3990_s10   ;;  %p4490_p3 = scmp.ne.s32.totalorder (!%p4489_p1), %s4483_s14, 0 }
  0x9b   : > { %394 = sbr.rel (%p4489_p1) target bundleno = 1159 (0x487), region = 56  ;;  %s2924_s3 = sshll.u32 (!%p4489_p1), %s4282_s29, 8 }
  0x9c   : > { %s397_s13 = scalar_lea.sflag (!%p4489_p1), [#allocation3], %s4282_s29  ;;  %s4286_s19 = scalar_lea.vmem (!%p4489_p1), [#allocation2], %s2924_s3 }
  0xa0   : > { %3961 = dma.done.wait (%p4490_p3), %s397_s13, 4096  }
  0xa1   : > { %3963 = vsyncadd (%p4490_p3), %s397_s13, 4294963200  ;;  %p4491_p4 = scmp.eq.s32.totalorder %s4087_s15, 0 }
  0xa3   : > { %3965 = dma.done.wait (%p4491_p4), [#allocation6], 9216   ;;  %p4492_p6 = pmov %p4491_p4 }
  0xa4   : > { %p4493_p8 = pmov %p4491_p4 }
  0xa5   : > { %3967 = vsyncadd (%p4492_p6), [#allocation6], 4294958080 }
  0xa6   : > { %3969 = dma.done.wait (%p4493_p8), [#allocation9], 9216   ;;  %p4494_p10 = pmov %p4491_p4 }
  0xa7   : > { %p4495_p7 = pmov %p4491_p4 }
  0xa8   : > { %3971 = vsyncadd (%p4494_p10), [#allocation9], 4294958080 }
  0xa9   : > { %3973 = dma.done.wait (%p4495_p7), [#allocation12], 9216   ;;  %p4496_p11 = pmov %p4491_p4 }
  0xaa   : > { %p4497_p13 = pmov %p4491_p4 }
  0xab   : > { %3975 = vsyncadd (%p4496_p11), [#allocation12], 4294958080 }
  0xac   : > { %3977 = dma.done.wait (%p4497_p13), [#allocation15], 9216   ;;  %p4498_p0 = pmov %p4491_p4 }
  0xad   : > { %v3618_v0 = vld [vmem:[#allocation5 + $0x38] sm:$0xff]   ;;  %v3619_v1 = vld [vmem:[#allocation5 + $0x30] sm:$0xff]   ;;  %v3620_v2 = vld [vmem:[#allocation5 + $0x28] sm:$0xff]   ;;  %s2933_s1 = sshll.u32 %s4282_s29, 9  ;;  %s3004_s24 = sshll.u32 %s4087_s15, 13 }
  0xae   : > { %3979 = vsyncadd (%p4498_p0), [#allocation15], 4294958080  ;;  %3165 = vmatprep.subr.bf16.mxu0 %v3618_v0  ;;  %v3621_v3 = vld [vmem:[#allocation5 + $0x20] sm:$0xff]   ;;  %v3622_v5 = vld [vmem:[#allocation5 + $0x18] sm:$0xff]   ;;  %s4341_s16 = scalar_lea.vmem [#allocation17], %s2933_s1  ;;  %s4410_s23 = scalar_lea.hbm %s4466_s9, %s3004_s24 }
  0xaf   : > { %3166 = vmatpush3.bf16.msra.mxu0 %v3618_v0  ;;  %v3626_v4 = vld [vmem:[%s4286_s19] sm:$0xff]   ;;  %v3623_v6 = vld [vmem:[#allocation5 + $0x10] sm:$0xff]   ;;  %v3624_v7 = vld [vmem:[#allocation5 + $0x8] sm:$0xff]   ;;  %s2760_s25 = sshll.u32 %s4341_s16, 4  ;;  %s2747_s15 = scalar_lea.sflag [#allocation4], %s4282_s29  ;;  %s4412_s25 = int_to_ptr.vmem [resolvable:$true] %s2760_s25 }
  0xb0   : > { %3167 = vmatprep.subr.bf16.mxu0 %v3619_v1  ;;  %3181 = vmatprep.mubr.bf16.mxu0 %v3626_v4  ;;  %v3625_v8 = vld [vmem:[#allocation5] sm:$0xff]   ;;  %v3627_v9 = vld [vmem:[%s4286_s19 + $0x8] sm:$0xff]   ;;  %v3628_v10 = vld [vmem:[%s4286_s19 + $0x10] sm:$0xff]   ;;  %s3918_s17 = scalar_lea.vmem %s4412_s25, 8192  ;;  %p4499_p5 = scmp.ne.s32.totalorder %s4484_s26, 0 }
  0xb1   : > { %v3629_v11 = vld [vmem:[%s4286_s19 + $0x18] sm:$0xff]   ;;  %v3630_v12 = vld [vmem:[%s4286_s19 + $0x20] sm:$0xff]   ;;  %v3659_v14 = vld [vmem:[#allocation8 + $0x30] sm:$0xff]   ;;  %p3919_p2 = scmp.ne.s32.totalorder %s4412_s25, %s3918_s17  ;;  %s4013_s27 = smov [#allocation17]  }
  0xb2   : > { %v3658_v13 = vld [vmem:[#allocation8 + $0x38] sm:$0xff]   ;;  %v3631_v15 = vld [vmem:[%s4286_s19 + $0x28] sm:$0xff]   ;;  %v3632_v17 = vld [vmem:[%s4286_s19 + $0x30] sm:$0xff]   ;;  %s3922_s2 = sshll.u32 %s4013_s27, 4  ;;  %s3923_s2 = int_to_ptr.vmem [resolvable:$false] %s3922_s2 }
  0xb3   : > { %3168 = vmatpush3.bf16.msra.mxu0 %v3619_v1  ;;  %3245 = vmatprep.subr.bf16.mxu1 %v3658_v13  ;;  %v3660_v16 = vld [vmem:[#allocation8 + $0x28] sm:$0xff]   ;;  %v3661_v18 = vld [vmem:[#allocation8 + $0x20] sm:$0xff]   ;;  %v3662_v19 = vld [vmem:[#allocation8 + $0x18] sm:$0xff]   ;;  %p3920_p9 = pnand %p3919_p2, %p4499_p5  ;;  %s3924_s21 = scalar_lea.vmem %s3923_s2, 16384 }
  0xb4   : > { %3169 = vmatprep.subr.bf16.mxu0 %v3620_v2  ;;  %3246 = vmatpush3.bf16.msra.mxu1 %v3658_v13  ;;  %v3633_v20 = vld [vmem:[%s4286_s19 + $0x38] sm:$0xff]   ;;  %v3634_v21 = vld [vmem:[%s4286_s19 + $0x40] sm:$0xff]   ;;  %v3635_v22 = vld [vmem:[%s4286_s19 + $0x48] sm:$0xff]   ;;  %p3925_p1 = scmp.lt.s32.totalorder %s4412_s25, %s3923_s2  ;;  %p3926_p3 = scmp.lt.s32.totalorder %s3924_s21, %s3918_s17 }
  0xb5   : > { %3247 = vmatprep.subr.bf16.mxu1 %v3659_v14  ;;  %v3636_v23 = vld [vmem:[%s4286_s19 + $0x50] sm:$0xff]   ;;  %v3637_v24 = vld [vmem:[%s4286_s19 + $0x58] sm:$0xff]   ;;  %v3638_v25 = vld [vmem:[%s4286_s19 + $0x60] sm:$0xff]   ;;  %p3921_p12 = pneg %p3920_p9 }
  0xb6   : > { %v3639_v26 = vld [vmem:[%s4286_s19 + $0x68] sm:$0xff]   ;;  %v3640_v27 = vld [vmem:[%s4286_s19 + $0x70] sm:$0xff]   ;;  %v3641_v28 = vld [vmem:[%s4286_s19 + $0x78] sm:$0xff]   ;;  %p3927_p4 = por %p3926_p3, %p3925_p1 }
  0xb7   : > { %3170 = vmatpush3.bf16.msra.mxu0 %v3620_v2  ;;  %v3642_v29 = vld [vmem:[%s4286_s19 + $0x80] sm:$0xff]   ;;  %v3643_v30 = vld [vmem:[%s4286_s19 + $0x88] sm:$0xff]   ;;  %v3644_v31 = vld [vmem:[%s4286_s19 + $0x90] sm:$0xff]  }
  0xb8   : > { %3171 = vmatprep.subr.bf16.mxu0 %v3621_v3  ;;  %3248 = vmatpush3.bf16.msra.mxu1 %v3659_v14  ;;  %v3663_v32 = vld [vmem:[#allocation8 + $0x10] sm:$0xff]   ;;  %v3645_v33 = vld [vmem:[%s4286_s19 + $0x98] sm:$0xff]   ;;  %v3664_v34 = vld [vmem:[#allocation8 + $0x8] sm:$0xff]   ;;  %p3928_p6 = pnand %p3927_p4, %p3921_p12 }
  0xb9   : > { %3249 = vmatprep.subr.bf16.mxu1 %v3660_v16  ;;  %v3646_v35 = vld [vmem:[%s4286_s19 + $0xa0] sm:$0xff]   ;;  %v3647_v37 = vld [vmem:[%s4286_s19 + $0xa8] sm:$0xff]   ;;  %v3648_v38 = vld [vmem:[%s4286_s19 + $0xb0] sm:$0xff]  }
  0xba   : > { %v3665_v36 = vld [vmem:[#allocation8] sm:$0xff]   ;;  %v3649_v39 = vld [vmem:[%s4286_s19 + $0xb8] sm:$0xff]   ;;  %v3651_v41 = vld [vmem:[%s4286_s19 + $0xc8] sm:$0xff]  }
  0xbb   : > { %3172 = vmatpush3.bf16.msra.mxu0 %v3621_v3  ;;  %v3650_v40 = vld [vmem:[%s4286_s19 + $0xc0] sm:$0xff]   ;;  %v3652_v42 = vld [vmem:[%s4286_s19 + $0xd0] sm:$0xff]   ;;  %v3653_v43 = vld [vmem:[%s4286_s19 + $0xd8] sm:$0xff]  }
  0xbc   : > { %3173 = vmatprep.subr.bf16.mxu0 %v3622_v5  ;;  %3250 = vmatpush3.bf16.msra.mxu1 %v3660_v16  ;;  %v3654_v44 = vld [vmem:[%s4286_s19 + $0xe0] sm:$0xff]   ;;  %v3655_v45 = vld [vmem:[%s4286_s19 + $0xe8] sm:$0xff]   ;;  %v3656_v46 = vld [vmem:[%s4286_s19 + $0xf0] sm:$0xff]  }
  0xbd   : > { %3251 = vmatprep.subr.bf16.mxu1 %v3661_v18  ;;  %v3657_v47 = vld [vmem:[%s4286_s19 + $0xf8] sm:$0xff]   ;;  %v3667_v49 = vld [vmem:[#allocation11 + $0x30] sm:$0xff]   ;;  %v3668_v50 = vld [vmem:[#allocation11 + $0x28] sm:$0xff]  }
  0xbe   : > { %v3666_v48 = vld [vmem:[#allocation11 + $0x38] sm:$0xff]   ;;  %v550_v53 = vld [vmem:[#allocation7] sm:$0xff]  ;;  %v552_v55 = vld [vmem:[#allocation7 + $0x10] sm:$0xff] }
  0xbf   : > { %3174 = vmatpush3.bf16.msra.mxu0 %v3622_v5  ;;  %v553_v54 = vld [vmem:[#allocation7 + $0x18] sm:$0xff]  ;;  %v551_v57 = vld [vmem:[#allocation7 + $0x8] sm:$0xff]  ;;  %v3669_v62 = vld [vmem:[#allocation11 + $0x20] sm:$0xff]  }
  0xc0   : > { %3175 = vmatprep.subr.bf16.mxu0 %v3623_v6  ;;  %3252 = vmatpush3.bf16.msra.mxu1 %v3661_v18  ;;  %v3670_v63 = vld [vmem:[#allocation11 + $0x18] sm:$0xff]   ;;  %v555_v14 = vld [vmem:[#allocation7 + $0x28] sm:$0xff] }
  0xc1   : > { %3253 = vmatprep.subr.bf16.mxu1 %v3662_v19 }
  0xc3   : > { %3176 = vmatpush3.bf16.msra.mxu0 %v3623_v6 }
  0xc4   : > { %3177 = vmatprep.subr.bf16.mxu0 %v3624_v7  ;;  %3254 = vmatpush3.bf16.msra.mxu1 %v3662_v19  ;;  %v3672_v19 = vld [vmem:[#allocation11 + $0x8] sm:$0xff]  }
  0xc5   : > { %3255 = vmatprep.subr.bf16.mxu1 %v3663_v32 }
  0xc7   : > { %3178 = vmatpush3.bf16.msra.mxu0 %v3624_v7  ;;  %v554_v7 = vld [vmem:[#allocation7 + $0x20] sm:$0xff] }
  0xc8   : > { %3179 = vmatprep.subr.bf16.mxu0 %v3625_v8  ;;  %3256 = vmatpush3.bf16.msra.mxu1 %v3663_v32 }
  0xc9   : > { %3257 = vmatprep.subr.bf16.mxu1 %v3664_v34 }
  0xcb   : > { %3180 = vmatpush3.bf16.msra.mxu0 %v3625_v8  ;;  %v557_v8 = vld [vmem:[#allocation7 + $0x38] sm:$0xff] }
  0xcc   : > { %3258 = vmatpush3.bf16.msra.mxu1 %v3664_v34  ;;  %3325 = vmatprep.subr.bf16.mxu0 %v3666_v48  ;;  %v559_v34 = vld [vmem:[#allocation7 + $0x48] sm:$0xff] }
  0xcd   : > { %3259 = vmatprep.subr.bf16.mxu1 %v3665_v36 }
  0xce   : > { %3182 = vmatmul.mubr.bf16.vlgmr.msra.gmra.mxu0 %v3627_v9  ;;  %v3671_v9 = vld [vmem:[#allocation11 + $0x10] sm:$0xff]  }
  0xcf   : > { %3185 = vmatprep.mubr.bf16.mxu0 %v3628_v10  ;;  %3326 = vmatpush3.bf16.msra.mxu0 %v3666_v48  ;;  %v556_v10 = vld [vmem:[#allocation7 + $0x30] sm:$0xff] }
  0xd0   : > { %3260 = vmatpush3.bf16.msra.mxu1 %v3665_v36  ;;  %3327 = vmatprep.subr.bf16.mxu0 %v3667_v49  ;;  %v564_v48 = vld [vmem:[#allocation7 + $0x70] sm:$0xff] }
  0xd3   : > { %3328 = vmatpush3.bf16.msra.mxu0 %v3667_v49 }
  0xd4   : > { %3329 = vmatprep.subr.bf16.mxu0 %v3668_v50 }
  0xd6   : > { %3186 = vmatmul.mubr.bf16.gmra.mxu0 %v3629_v11 }
  0xd7   : > { %3189 = vmatprep.mubr.bf16.mxu0 %v3630_v12  ;;  %3330 = vmatpush3.bf16.msra.mxu0 %v3668_v50 }
  0xd8   : > { %3331 = vmatprep.subr.bf16.mxu0 %v3669_v62 }
  0xdb   : > { %3332 = vmatpush3.bf16.msra.mxu0 %v3669_v62 }
  0xdc   : > { %3333 = vmatprep.subr.bf16.mxu0 %v3670_v63 }
  0xde   : > { %3190 = vmatmul.mubr.bf16.gmra.mxu0 %v3631_v15 }
  0xdf   : > { %3193 = vmatprep.mubr.bf16.mxu0 %v3632_v17  ;;  %3334 = vmatpush3.bf16.msra.mxu0 %v3670_v63 }
  0xe0   : > { %3335 = vmatprep.subr.bf16.mxu0 %v3671_v9 }
  0xe3   : > { %3336 = vmatpush3.bf16.msra.mxu0 %v3671_v9 }
  0xe4   : > { %3337 = vmatprep.subr.bf16.mxu0 %v3672_v19 }
  0xe6   : > { %3194 = vmatmul.mubr.bf16.gmra.mxu0 %v3633_v20 }
  0xe7   : > { %3197 = vmatprep.mubr.bf16.mxu0 %v3634_v21  ;;  %3338 = vmatpush3.bf16.msra.mxu0 %v3672_v19  ;;  %v573_v19 = vld [vmem:[#allocation7 + $0xb8] sm:$0xff] }
  0xee   : > { %3198 = vmatmul.mubr.bf16.gmra.mxu0 %v3635_v22 }
  0xef   : > { %3201 = vmatprep.mubr.bf16.mxu0 %v3636_v23 }
  0xf6   : > { %3202 = vmatmul.mubr.bf16.gmra.mxu0 %v3637_v24 }
  0xf7   : > { %3205 = vmatprep.mubr.bf16.mxu0 %v3638_v25 }
  0xfe   : > { %3206 = vmatmul.mubr.bf16.gmra.mxu0 %v3639_v26 }
  0xff   : > { %3209 = vmatprep.mubr.bf16.mxu0 %v3640_v27  ;;  %v558_v27 = vld [vmem:[#allocation7 + $0x40] sm:$0xff] }
 0x106   : > { %3210 = vmatmul.mubr.bf16.gmra.mxu0 %v3641_v28  ;;  %v561_v28 = vld [vmem:[#allocation7 + $0x58] sm:$0xff] }
 0x107   : > { %3213 = vmatprep.mubr.bf16.mxu0 %v3642_v29  ;;  %v3673_v29 = vld [vmem:[#allocation11] sm:$0xff]  }
 0x108   : > { %3339 = vmatprep.subr.bf16.mxu0 %v3673_v29 }
 0x109   : > { %3340 = vmatpush3.bf16.msra.mxu0 %v3673_v29 }
 0x10e   : > { %3214 = vmatmul.mubr.bf16.gmra.mxu0 %v3643_v30  ;;  %v560_v30 = vld [vmem:[#allocation7 + $0x50] sm:$0xff] }
 0x10f   : > { %3217 = vmatprep.mubr.bf16.mxu0 %v3644_v31 }
 0x116   : > { %3218 = vmatmul.mubr.bf16.gmra.mxu0 %v3645_v33 }
 0x117   : > { %3221 = vmatprep.mubr.bf16.mxu0 %v3646_v35 }
 0x11e   : > { %3222 = vmatmul.mubr.bf16.gmra.mxu0 %v3647_v37 }
 0x11f   : > { %3225 = vmatprep.mubr.bf16.mxu0 %v3648_v38 }
 0x126   : > { %3226 = vmatmul.mubr.bf16.gmra.mxu0 %v3649_v39 }
 0x127   : > { %3229 = vmatprep.mubr.bf16.mxu0 %v3650_v40 }
 0x12e   : > { %3230 = vmatmul.mubr.bf16.gmra.mxu0 %v3651_v41 }
 0x12f   : > { %3233 = vmatprep.mubr.bf16.mxu0 %v3652_v42 }
 0x136   : > { %3234 = vmatmul.mubr.bf16.gmra.mxu0 %v3653_v43 }
 0x137   : > { %3237 = vmatprep.mubr.bf16.mxu0 %v3654_v44 }
 0x13e   : > { %3238 = vmatmul.mubr.bf16.gmra.mxu0 %v3655_v45 }
 0x13f   : > { %3241 = vmatprep.mubr.bf16.mxu0 %v3656_v46  ;;  %v562_v46 = vld [vmem:[#allocation7 + $0x60] sm:$0xff] }
 0x146   : > { %3242 = vmatmul.mubr.bf16.gmra.mxu0 %v3657_v47  ;;  %v565_v47 = vld [vmem:[#allocation7 + $0x78] sm:$0xff] }
 0x18e   : > { %v3183_v51 = vpop.f32.mrf.mxu0 }
 0x18f   : > { %v897_v60 = vadd.f32 %v3183_v51, %v552_v55 }
 0x190   : > { %v888_v52 = vpop.f32.mrf.mxu0 }
 0x191   : > { %v889_v58 = vadd.f32 %v888_v52, %v550_v53  ;;  %v1145_v5 = vmax.f32 %v897_v60, 0.0  ;;  %v563_v52 = vld [vmem:[#allocation7 + $0x68] sm:$0xff] }
 0x192   : > { %v3184_v56 = vpop.f32.mrf.mxu0 }
 0x193   : > { %v900_v59 = vadd.f32 %v3184_v56, %v553_v54  ;;  %v1143_v3 = vmax.f32 %v889_v58, 0.0 }
 0x194   : > { %v891_v61 = vpop.f32.mrf.mxu0 }
 0x195   : > { %v892_v0 = vadd.f32 %v891_v61, %v551_v57  ;;  %v1146_v1 = vmax.f32 %v900_v59, 0.0 }
 0x196   : > { %v3187_v2 = vpop.f32.mrf.mxu0 }
 0x197   : > { %v1144_v4 = vmax.f32 %v892_v0, 0.0  ;;  %v1208_v12 = vpack.c.bf16 %v1146_v1, %v1145_v5  ;;  %v913_v17 = vadd.f32 %v3187_v2, %v556_v10  ;;  %v566_v0 = vld [vmem:[#allocation7 + $0x80] sm:$0xff]  ;;  %v569_v1 = vld [vmem:[#allocation7 + $0x98] sm:$0xff]  ;;  %v568_v2 = vld [vmem:[#allocation7 + $0x90] sm:$0xff] }
 0x198   : > { %v904_v6 = vpop.f32.mrf.mxu0 }
 0x199   : > { %v1207_v11 = vpack.c.bf16 %v1144_v4, %v1143_v3  ;;  %v905_v15 = vadd.f32 %v904_v6, %v554_v7  ;;  %v1149_v25 = vmax.f32 %v913_v17, 0.0  ;;  %v567_v6 = vld [vmem:[#allocation7 + $0x88] sm:$0xff] }
 0x19a   : > { %v3188_v13 = vpop.f32.mrf.mxu0 }
 0x19b   : > { %v916_v16 = vadd.f32 %v3188_v13, %v557_v8  ;;  %3261 = vmatprep.mubr.bf16.mxu1 %v1207_v11  ;;  %v1147_v23 = vmax.f32 %v905_v15, 0.0 }
 0x19c   : > { %v907_v18 = vpop.f32.mrf.mxu0  ;;  %3262 = vmatmul.mubr.bf16.vlgmr.msra.gmra.mxu1 %v1208_v12 }
 0x19d   : > { %v908_v20 = vadd.f32 %v907_v18, %v555_v14  ;;  %v1150_v21 = vmax.f32 %v916_v16, 0.0  ;;  %v570_v18 = vld [vmem:[#allocation7 + $0xa0] sm:$0xff] }
 0x19e   : > { %v3191_v22 = vpop.f32.mrf.mxu0 }
 0x19f   : > { %v1148_v24 = vmax.f32 %v908_v20, 0.0  ;;  %v1210_v32 = vpack.c.bf16 %v1150_v21, %v1149_v25  ;;  %v929_v37 = vadd.f32 %v3191_v22, %v560_v30  ;;  %v572_v21 = vld [vmem:[#allocation7 + $0xb0] sm:$0xff] }
 0x1a0   : > { %v920_v26 = vpop.f32.mrf.mxu0 }
 0x1a1   : > { %v1209_v31 = vpack.c.bf16 %v1148_v24, %v1147_v23  ;;  %v921_v35 = vadd.f32 %v920_v26, %v558_v27  ;;  %v1153_v44 = vmax.f32 %v929_v37, 0.0  ;;  %v571_v24 = vld [vmem:[#allocation7 + $0xa8] sm:$0xff]  ;;  %v577_v37 = vld [vmem:[#allocation7 + $0xd8] sm:$0xff] }
 0x1a2   : > { %v3192_v33 = vpop.f32.mrf.mxu0 }
 0x1a3   : > { %v932_v36 = vadd.f32 %v3192_v33, %v561_v28  ;;  %3265 = vmatprep.mubr.bf16.mxu1 %v1209_v31  ;;  %v1151_v42 = vmax.f32 %v921_v35, 0.0 }
 0x1a4   : > { %v923_v38 = vpop.f32.mrf.mxu0  ;;  %3266 = vmatmul.mubr.bf16.gmra.mxu1 %v1210_v32 }
 0x1a5   : > { %v924_v39 = vadd.f32 %v923_v38, %v559_v34  ;;  %v1154_v40 = vmax.f32 %v932_v36, 0.0  ;;  %v574_v36 = vld [vmem:[#allocation7 + $0xc0] sm:$0xff] }
 0x1a6   : > { %v3195_v41 = vpop.f32.mrf.mxu0 }
 0x1a7   : > { %v1152_v43 = vmax.f32 %v924_v39, 0.0  ;;  %v1212_v50 = vpack.c.bf16 %v1154_v40, %v1153_v44  ;;  %v945_v55 = vadd.f32 %v3195_v41, %v564_v48  ;;  %v576_v39 = vld [vmem:[#allocation7 + $0xd0] sm:$0xff] }
 0x1a8   : > { %v936_v45 = vpop.f32.mrf.mxu0 }
 0x1a9   : > { %v1211_v49 = vpack.c.bf16 %v1152_v43, %v1151_v42  ;;  %v937_v53 = vadd.f32 %v936_v45, %v562_v46  ;;  %v1157_v62 = vmax.f32 %v945_v55, 0.0  ;;  %v575_v42 = vld [vmem:[#allocation7 + $0xc8] sm:$0xff]  ;;  %v581_v55 = vld [vmem:[#allocation7 + $0xf8] sm:$0xff] }
 0x1aa   : > { %v3196_v51 = vpop.f32.mrf.mxu0 }
 0x1ab   : > { %v948_v54 = vadd.f32 %v3196_v51, %v565_v47  ;;  %3269 = vmatprep.mubr.bf16.mxu1 %v1211_v49  ;;  %v1155_v60 = vmax.f32 %v937_v53, 0.0 }
 0x1ac   : > { %v939_v56 = vpop.f32.mrf.mxu0  ;;  %3270 = vmatmul.mubr.bf16.gmra.mxu1 %v1212_v50 }
 0x1ad   : > { %v940_v57 = vadd.f32 %v939_v56, %v563_v52  ;;  %v1158_v58 = vmax.f32 %v948_v54, 0.0  ;;  %v578_v54 = vld [vmem:[#allocation7 + $0xe0] sm:$0xff] }
 0x1ae   : > { %v3199_v59 = vpop.f32.mrf.mxu0 }
 0x1af   : > { %v1156_v61 = vmax.f32 %v940_v57, 0.0  ;;  %v1214_v4 = vpack.c.bf16 %v1158_v58, %v1157_v62  ;;  %v961_v9 = vadd.f32 %v3199_v59, %v568_v2  ;;  %v580_v57 = vld [vmem:[#allocation7 + $0xf0] sm:$0xff] }
 0x1b0   : > { %v952_v63 = vpop.f32.mrf.mxu0 }
 0x1b1   : > { %v1213_v3 = vpack.c.bf16 %v1156_v61, %v1155_v60  ;;  %v953_v7 = vadd.f32 %v952_v63, %v566_v0  ;;  %v1161_v16 = vmax.f32 %v961_v9, 0.0  ;;  %v579_v60 = vld [vmem:[#allocation7 + $0xe8] sm:$0xff]  ;;  %v585_v9 = vld [vmem:[#allocation7 + $0x118] sm:$0xff] }
 0x1b2   : > { %v3200_v5 = vpop.f32.mrf.mxu0 }
 0x1b3   : > { %v964_v8 = vadd.f32 %v3200_v5, %v569_v1  ;;  %3273 = vmatprep.mubr.bf16.mxu1 %v1213_v3  ;;  %v1159_v14 = vmax.f32 %v953_v7, 0.0 }
 0x1b4   : > { %v955_v10 = vpop.f32.mrf.mxu0  ;;  %3274 = vmatmul.mubr.bf16.gmra.mxu1 %v1214_v4 }
 0x1b5   : > { %v956_v11 = vadd.f32 %v955_v10, %v567_v6  ;;  %v1162_v12 = vmax.f32 %v964_v8, 0.0  ;;  %v582_v8 = vld [vmem:[#allocation7 + $0x100] sm:$0xff] }
 0x1b6   : > { %v3203_v13 = vpop.f32.mrf.mxu0 }
 0x1b7   : > { %v1160_v15 = vmax.f32 %v956_v11, 0.0  ;;  %v1216_v22 = vpack.c.bf16 %v1162_v12, %v1161_v16  ;;  %v977_v27 = vadd.f32 %v3203_v13, %v572_v21  ;;  %v584_v11 = vld [vmem:[#allocation7 + $0x110] sm:$0xff] }
 0x1b8   : > { %v968_v17 = vpop.f32.mrf.mxu0 }
 0x1b9   : > { %v1215_v20 = vpack.c.bf16 %v1160_v15, %v1159_v14  ;;  %v969_v25 = vadd.f32 %v968_v17, %v570_v18  ;;  %v1165_v34 = vmax.f32 %v977_v27, 0.0  ;;  %v583_v14 = vld [vmem:[#allocation7 + $0x108] sm:$0xff]  ;;  %v589_v27 = vld [vmem:[#allocation7 + $0x138] sm:$0xff] }
 0x1ba   : > { %v3204_v23 = vpop.f32.mrf.mxu0 }
 0x1bb   : > { %v980_v26 = vadd.f32 %v3204_v23, %v573_v19  ;;  %3277 = vmatprep.mubr.bf16.mxu1 %v1215_v20  ;;  %v1163_v32 = vmax.f32 %v969_v25, 0.0 }
 0x1bc   : > { %v971_v28 = vpop.f32.mrf.mxu0  ;;  %3278 = vmatmul.mubr.bf16.gmra.mxu1 %v1216_v22 }
 0x1bd   : > { %v972_v29 = vadd.f32 %v971_v28, %v571_v24  ;;  %v1166_v30 = vmax.f32 %v980_v26, 0.0  ;;  %v586_v26 = vld [vmem:[#allocation7 + $0x120] sm:$0xff] }
 0x1be   : > { %v3207_v31 = vpop.f32.mrf.mxu0 }
 0x1bf   : > { %v1164_v33 = vmax.f32 %v972_v29, 0.0  ;;  %v1218_v40 = vpack.c.bf16 %v1166_v30, %v1165_v34  ;;  %v993_v45 = vadd.f32 %v3207_v31, %v576_v39  ;;  %v588_v29 = vld [vmem:[#allocation7 + $0x130] sm:$0xff] }
 0x1c0   : > { %v984_v35 = vpop.f32.mrf.mxu0 }
 0x1c1   : > { %v1217_v38 = vpack.c.bf16 %v1164_v33, %v1163_v32  ;;  %v985_v43 = vadd.f32 %v984_v35, %v574_v36  ;;  %v1169_v52 = vmax.f32 %v993_v45, 0.0  ;;  %v587_v32 = vld [vmem:[#allocation7 + $0x128] sm:$0xff]  ;;  %v593_v45 = vld [vmem:[#allocation7 + $0x158] sm:$0xff] }
 0x1c2   : > { %v3208_v41 = vpop.f32.mrf.mxu0 }
 0x1c3   : > { %v996_v44 = vadd.f32 %v3208_v41, %v577_v37  ;;  %3281 = vmatprep.mubr.bf16.mxu1 %v1217_v38  ;;  %v1167_v50 = vmax.f32 %v985_v43, 0.0 }
 0x1c4   : > { %v987_v46 = vpop.f32.mrf.mxu0  ;;  %3282 = vmatmul.mubr.bf16.gmra.mxu1 %v1218_v40 }
 0x1c5   : > { %v988_v47 = vadd.f32 %v987_v46, %v575_v42  ;;  %v1170_v48 = vmax.f32 %v996_v44, 0.0  ;;  %v590_v44 = vld [vmem:[#allocation7 + $0x140] sm:$0xff] }
 0x1c6   : > { %v3211_v49 = vpop.f32.mrf.mxu0 }
 0x1c7   : > { %v1168_v51 = vmax.f32 %v988_v47, 0.0  ;;  %v1220_v58 = vpack.c.bf16 %v1170_v48, %v1169_v52  ;;  %v1009_v63 = vadd.f32 %v3211_v49, %v580_v57  ;;  %v592_v47 = vld [vmem:[#allocation7 + $0x150] sm:$0xff] }
 0x1c8   : > { %v1000_v53 = vpop.f32.mrf.mxu0 }
 0x1c9   : > { %v1219_v56 = vpack.c.bf16 %v1168_v51, %v1167_v50  ;;  %v1001_v61 = vadd.f32 %v1000_v53, %v578_v54  ;;  %v1173_v6 = vmax.f32 %v1009_v63, 0.0  ;;  %v591_v50 = vld [vmem:[#allocation7 + $0x148] sm:$0xff]  ;;  %v597_v63 = vld [vmem:[#allocation7 + $0x178] sm:$0xff] }
 0x1ca   : > { %v3212_v59 = vpop.f32.mrf.mxu0 }
 0x1cb   : > { %v1012_v62 = vadd.f32 %v3212_v59, %v581_v55  ;;  %3285 = vmatprep.mubr.bf16.mxu1 %v1219_v56  ;;  %v1171_v4 = vmax.f32 %v1001_v61, 0.0 }
 0x1cc   : > { %v1003_v0 = vpop.f32.mrf.mxu0  ;;  %3286 = vmatmul.mubr.bf16.gmra.mxu1 %v1220_v58 }
 0x1cd   : > { %v1004_v1 = vadd.f32 %v1003_v0, %v579_v60  ;;  %v1174_v2 = vmax.f32 %v1012_v62, 0.0  ;;  %v594_v62 = vld [vmem:[#allocation7 + $0x160] sm:$0xff] }
 0x1ce   : > { %v3215_v3 = vpop.f32.mrf.mxu0 }
 0x1cf   : > { %v1172_v5 = vmax.f32 %v1004_v1, 0.0  ;;  %v1222_v12 = vpack.c.bf16 %v1174_v2, %v1173_v6  ;;  %v1025_v17 = vadd.f32 %v3215_v3, %v584_v11  ;;  %v596_v1 = vld [vmem:[#allocation7 + $0x170] sm:$0xff] }
 0x1d0   : > { %v1016_v7 = vpop.f32.mrf.mxu0 }
 0x1d1   : > { %v1221_v10 = vpack.c.bf16 %v1172_v5, %v1171_v4  ;;  %v1017_v15 = vadd.f32 %v1016_v7, %v582_v8  ;;  %v1177_v24 = vmax.f32 %v1025_v17, 0.0  ;;  %v595_v4 = vld [vmem:[#allocation7 + $0x168] sm:$0xff]  ;;  %v601_v17 = vld [vmem:[#allocation7 + $0x198] sm:$0xff] }
 0x1d2   : > { %v3216_v13 = vpop.f32.mrf.mxu0 }
 0x1d3   : > { %v1028_v16 = vadd.f32 %v3216_v13, %v585_v9  ;;  %3289 = vmatprep.mubr.bf16.mxu1 %v1221_v10  ;;  %v1175_v22 = vmax.f32 %v1017_v15, 0.0 }
 0x1d4   : > { %v1019_v18 = vpop.f32.mrf.mxu0  ;;  %3290 = vmatmul.mubr.bf16.gmra.mxu1 %v1222_v12 }
 0x1d5   : > { %v1020_v19 = vadd.f32 %v1019_v18, %v583_v14  ;;  %v1178_v20 = vmax.f32 %v1028_v16, 0.0  ;;  %v598_v16 = vld [vmem:[#allocation7 + $0x180] sm:$0xff] }
 0x1d6   : > { %v3219_v21 = vpop.f32.mrf.mxu0 }
 0x1d7   : > { %v1176_v23 = vmax.f32 %v1020_v19, 0.0  ;;  %v1224_v30 = vpack.c.bf16 %v1178_v20, %v1177_v24  ;;  %v1041_v35 = vadd.f32 %v3219_v21, %v588_v29  ;;  %v600_v19 = vld [vmem:[#allocation7 + $0x190] sm:$0xff] }
 0x1d8   : > { %v1032_v25 = vpop.f32.mrf.mxu0 }
 0x1d9   : > { %v1223_v28 = vpack.c.bf16 %v1176_v23, %v1175_v22  ;;  %v1033_v33 = vadd.f32 %v1032_v25, %v586_v26  ;;  %v1181_v42 = vmax.f32 %v1041_v35, 0.0  ;;  %v599_v22 = vld [vmem:[#allocation7 + $0x188] sm:$0xff]  ;;  %v605_v35 = vld [vmem:[#allocation7 + $0x1b8] sm:$0xff] }
 0x1da   : > { %v3220_v31 = vpop.f32.mrf.mxu0 }
 0x1db   : > { %v1044_v34 = vadd.f32 %v3220_v31, %v589_v27  ;;  %3293 = vmatprep.mubr.bf16.mxu1 %v1223_v28  ;;  %v1179_v40 = vmax.f32 %v1033_v33, 0.0 }
 0x1dc   : > { %v1035_v36 = vpop.f32.mrf.mxu0  ;;  %3294 = vmatmul.mubr.bf16.gmra.mxu1 %v1224_v30 }
 0x1dd   : > { %v1036_v37 = vadd.f32 %v1035_v36, %v587_v32  ;;  %v1182_v38 = vmax.f32 %v1044_v34, 0.0  ;;  %v602_v34 = vld [vmem:[#allocation7 + $0x1a0] sm:$0xff] }
 0x1de   : > { %v3223_v39 = vpop.f32.mrf.mxu0 }
 0x1df   : > { %v1180_v41 = vmax.f32 %v1036_v37, 0.0  ;;  %v1226_v48 = vpack.c.bf16 %v1182_v38, %v1181_v42  ;;  %v1057_v53 = vadd.f32 %v3223_v39, %v592_v47  ;;  %v604_v37 = vld [vmem:[#allocation7 + $0x1b0] sm:$0xff] }
 0x1e0   : > { %v1048_v43 = vpop.f32.mrf.mxu0 }
 0x1e1   : > { %v1225_v46 = vpack.c.bf16 %v1180_v41, %v1179_v40  ;;  %v1049_v51 = vadd.f32 %v1048_v43, %v590_v44  ;;  %v1185_v60 = vmax.f32 %v1057_v53, 0.0  ;;  %v603_v40 = vld [vmem:[#allocation7 + $0x1a8] sm:$0xff]  ;;  %v609_v53 = vld [vmem:[#allocation7 + $0x1d8] sm:$0xff] }
 0x1e2   : > { %v3224_v49 = vpop.f32.mrf.mxu0 }
 0x1e3   : > { %v1060_v52 = vadd.f32 %v3224_v49, %v593_v45  ;;  %3297 = vmatprep.mubr.bf16.mxu1 %v1225_v46  ;;  %v1183_v58 = vmax.f32 %v1049_v51, 0.0 }
 0x1e4   : > { %v1051_v54 = vpop.f32.mrf.mxu0  ;;  %3298 = vmatmul.mubr.bf16.gmra.mxu1 %v1226_v48 }
 0x1e5   : > { %v1052_v55 = vadd.f32 %v1051_v54, %v591_v50  ;;  %v1186_v56 = vmax.f32 %v1060_v52, 0.0  ;;  %v606_v52 = vld [vmem:[#allocation7 + $0x1c0] sm:$0xff] }
 0x1e6   : > { %v3227_v57 = vpop.f32.mrf.mxu0 }
 0x1e7   : > { %v1184_v59 = vmax.f32 %v1052_v55, 0.0  ;;  %v1228_v2 = vpack.c.bf16 %v1186_v56, %v1185_v60  ;;  %v1073_v7 = vadd.f32 %v3227_v57, %v596_v1  ;;  %v608_v55 = vld [vmem:[#allocation7 + $0x1d0] sm:$0xff] }
 0x1e8   : > { %v1064_v61 = vpop.f32.mrf.mxu0 }
 0x1e9   : > { %v1227_v0 = vpack.c.bf16 %v1184_v59, %v1183_v58  ;;  %v1065_v5 = vadd.f32 %v1064_v61, %v594_v62  ;;  %v1189_v14 = vmax.f32 %v1073_v7, 0.0  ;;  %v607_v58 = vld [vmem:[#allocation7 + $0x1c8] sm:$0xff]  ;;  %v613_v7 = vld [vmem:[#allocation7 + $0x1f8] sm:$0xff] }
 0x1ea   : > { %v3228_v3 = vpop.f32.mrf.mxu0 }
 0x1eb   : > { %v1076_v6 = vadd.f32 %v3228_v3, %v597_v63  ;;  %3301 = vmatprep.mubr.bf16.mxu1 %v1227_v0  ;;  %v1187_v12 = vmax.f32 %v1065_v5, 0.0 }
 0x1ec   : > { %v1067_v8 = vpop.f32.mrf.mxu0  ;;  %3302 = vmatmul.mubr.bf16.gmra.mxu1 %v1228_v2 }
 0x1ed   : > { %v1068_v9 = vadd.f32 %v1067_v8, %v595_v4  ;;  %v1190_v10 = vmax.f32 %v1076_v6, 0.0  ;;  %v610_v6 = vld [vmem:[#allocation7 + $0x1e0] sm:$0xff] }
 0x1ee   : > { %v3231_v11 = vpop.f32.mrf.mxu0 }
 0x1ef   : > { %v1188_v13 = vmax.f32 %v1068_v9, 0.0  ;;  %v1230_v20 = vpack.c.bf16 %v1190_v10, %v1189_v14  ;;  %v1089_v25 = vadd.f32 %v3231_v11, %v600_v19  ;;  %v612_v9 = vld [vmem:[#allocation7 + $0x1f0] sm:$0xff] }
 0x1f0   : > { %v1080_v15 = vpop.f32.mrf.mxu0 }
 0x1f1   : > { %v1229_v18 = vpack.c.bf16 %v1188_v13, %v1187_v12  ;;  %v1081_v23 = vadd.f32 %v1080_v15, %v598_v16  ;;  %v1193_v32 = vmax.f32 %v1089_v25, 0.0  ;;  %v611_v12 = vld [vmem:[#allocation7 + $0x1e8] sm:$0xff]  ;;  %v3675_v25 = vld [vmem:[#allocation14 + $0x30] sm:$0xff]  }
 0x1f2   : > { %v3232_v21 = vpop.f32.mrf.mxu0 }
 0x1f3   : > { %v1092_v24 = vadd.f32 %v3232_v21, %v601_v17  ;;  %3305 = vmatprep.mubr.bf16.mxu1 %v1229_v18  ;;  %v1191_v30 = vmax.f32 %v1081_v23, 0.0 }
 0x1f4   : > { %v1083_v26 = vpop.f32.mrf.mxu0  ;;  %3306 = vmatmul.mubr.bf16.gmra.mxu1 %v1230_v20 }
 0x1f5   : > { %v1084_v27 = vadd.f32 %v1083_v26, %v599_v22  ;;  %v1194_v28 = vmax.f32 %v1092_v24, 0.0  ;;  %v3674_v24 = vld [vmem:[#allocation14 + $0x38] sm:$0xff]   ;;  %v3676_v26 = vld [vmem:[#allocation14 + $0x28] sm:$0xff]  }
 0x1f6   : > { %v3235_v29 = vpop.f32.mrf.mxu0  ;;  %3405 = vmatprep.subr.bf16.mxu1 %v3674_v24 }
 0x1f7   : > { %v1192_v31 = vmax.f32 %v1084_v27, 0.0  ;;  %v1232_v38 = vpack.c.bf16 %v1194_v28, %v1193_v32  ;;  %v1105_v43 = vadd.f32 %v3235_v29, %v604_v37  ;;  %3406 = vmatpush3.bf16.msra.mxu1 %v3674_v24  ;;  %v1255_v29 = vld [vmem:[#allocation10] sm:$0xff]  ;;  %v1269_v24 = vld [vmem:[#allocation10 + $0x70] sm:$0xff] }
 0x1f8   : > { %v1096_v33 = vpop.f32.mrf.mxu0  ;;  %3407 = vmatprep.subr.bf16.mxu1 %v3675_v25 }
 0x1f9   : > { %v1231_v36 = vpack.c.bf16 %v1192_v31, %v1191_v30  ;;  %v1097_v41 = vadd.f32 %v1096_v33, %v602_v34  ;;  %v1197_v50 = vmax.f32 %v1105_v43, 0.0  ;;  %v1258_v30 = vld [vmem:[#allocation10 + $0x18] sm:$0xff]  ;;  %v1257_v31 = vld [vmem:[#allocation10 + $0x10] sm:$0xff]  ;;  %v1256_v33 = vld [vmem:[#allocation10 + $0x8] sm:$0xff] }
 0x1fa   : > { %v3236_v39 = vpop.f32.mrf.mxu0 }
 0x1fb   : > { %v1108_v42 = vadd.f32 %v3236_v39, %v605_v35  ;;  %3309 = vmatprep.mubr.bf16.mxu1 %v1231_v36  ;;  %v1195_v48 = vmax.f32 %v1097_v41, 0.0  ;;  %3408 = vmatpush3.bf16.msra.mxu1 %v3675_v25  ;;  %v3678_v39 = vld [vmem:[#allocation14 + $0x18] sm:$0xff]  }
 0x1fc   : > { %v1099_v44 = vpop.f32.mrf.mxu0  ;;  %3310 = vmatmul.mubr.bf16.gmra.mxu1 %v1232_v38  ;;  %3409 = vmatprep.subr.bf16.mxu1 %v3676_v26  ;;  %v3677_v38 = vld [vmem:[#allocation14 + $0x20] sm:$0xff]  }
 0x1fd   : > { %v1100_v45 = vadd.f32 %v1099_v44, %v603_v40  ;;  %v1198_v46 = vmax.f32 %v1108_v42, 0.0 }
 0x1fe   : > { %v3239_v47 = vpop.f32.mrf.mxu0 }
 0x1ff   : > { %v1196_v49 = vmax.f32 %v1100_v45, 0.0  ;;  %v1234_v56 = vpack.c.bf16 %v1198_v46, %v1197_v50  ;;  %v1121_v61 = vadd.f32 %v3239_v47, %v608_v55  ;;  %3410 = vmatpush3.bf16.msra.mxu1 %v3676_v26  ;;  %v1259_v47 = vld [vmem:[#allocation10 + $0x20] sm:$0xff]  ;;  %v1261_v50 = vld [vmem:[#allocation10 + $0x30] sm:$0xff] }
 0x200   : > { %v1112_v51 = vpop.f32.mrf.mxu0  ;;  %3411 = vmatprep.subr.bf16.mxu1 %v3677_v38 }
 0x201   : > { %v1233_v54 = vpack.c.bf16 %v1196_v49, %v1195_v48  ;;  %v1113_v59 = vadd.f32 %v1112_v51, %v606_v52  ;;  %v1201_v4 = vmax.f32 %v1121_v61, 0.0  ;;  %v1262_v48 = vld [vmem:[#allocation10 + $0x38] sm:$0xff]  ;;  %v3679_v49 = vld [vmem:[#allocation14 + $0x10] sm:$0xff]  }
 0x202   : > { %v3240_v57 = vpop.f32.mrf.mxu0 }
 0x203   : > { %v1124_v60 = vadd.f32 %v3240_v57, %v609_v53  ;;  %3313 = vmatprep.mubr.bf16.mxu1 %v1233_v54  ;;  %v1199_v2 = vmax.f32 %v1113_v59, 0.0  ;;  %3412 = vmatpush3.bf16.msra.mxu1 %v3677_v38  ;;  %v1260_v54 = vld [vmem:[#allocation10 + $0x28] sm:$0xff] }
 0x204   : > { %v1115_v62 = vpop.f32.mrf.mxu0  ;;  %3314 = vmatmul.mubr.bf16.gmra.mxu1 %v1234_v56  ;;  %3413 = vmatprep.subr.bf16.mxu1 %v3678_v39  ;;  %v3680_v59 = vld [vmem:[#allocation14 + $0x8] sm:$0xff]  }
 0x205   : > { %v1116_v63 = vadd.f32 %v1115_v62, %v607_v58  ;;  %v1202_v0 = vmax.f32 %v1124_v60, 0.0 }
 0x206   : > { %v3243_v1 = vpop.f32.mrf.mxu0 }
 0x207   : > { %v1200_v3 = vmax.f32 %v1116_v63, 0.0  ;;  %v1236_v10 = vpack.c.bf16 %v1202_v0, %v1201_v4  ;;  %v1137_v15 = vadd.f32 %v3243_v1, %v612_v9  ;;  %3414 = vmatpush3.bf16.msra.mxu1 %v3678_v39  ;;  %v1266_v4 = vld [vmem:[#allocation10 + $0x58] sm:$0xff] }
 0x208   : > { %v1128_v5 = vpop.f32.mrf.mxu0  ;;  %3415 = vmatprep.subr.bf16.mxu1 %v3679_v49 }
 0x209   : > { %v1235_v8 = vpack.c.bf16 %v1200_v3, %v1199_v2  ;;  %v1129_v13 = vadd.f32 %v1128_v5, %v610_v6  ;;  %v1205_v21 = vmax.f32 %v1137_v15, 0.0  ;;  %v1263_v3 = vld [vmem:[#allocation10 + $0x40] sm:$0xff]  ;;  %v1265_v6 = vld [vmem:[#allocation10 + $0x50] sm:$0xff] }
 0x20a   : > { %v3244_v11 = vpop.f32.mrf.mxu0  ;;  %v3681_v5 = vld [vmem:[#allocation14] sm:$0xff]  }
 0x20b   : > { %v1140_v14 = vadd.f32 %v3244_v11, %v613_v7  ;;  %3317 = vmatprep.mubr.bf16.mxu1 %v1235_v8  ;;  %v1203_v19 = vmax.f32 %v1129_v13, 0.0  ;;  %3416 = vmatpush3.bf16.msra.mxu1 %v3679_v49 }
 0x20c   : > { %v1131_v16 = vpop.f32.mrf.mxu0  ;;  %3318 = vmatmul.mubr.bf16.gmra.mxu1 %v1236_v10  ;;  %3417 = vmatprep.subr.bf16.mxu1 %v3680_v59  ;;  %v1264_v10 = vld [vmem:[#allocation10 + $0x48] sm:$0xff] }
 0x20d   : > { %v1132_v17 = vadd.f32 %v1131_v16, %v611_v12  ;;  %v1206_v18 = vmax.f32 %v1140_v14, 0.0 }
 0x20f   : > { %v1204_v20 = vmax.f32 %v1132_v17, 0.0  ;;  %v1238_v23 = vpack.c.bf16 %v1206_v18, %v1205_v21  ;;  %3418 = vmatpush3.bf16.msra.mxu1 %v3680_v59  ;;  %v1278_v59 = vld [vmem:[#allocation10 + $0xb8] sm:$0xff] }
 0x210   : > { %3419 = vmatprep.subr.bf16.mxu1 %v3681_v5 }
 0x211   : > { %v1237_v22 = vpack.c.bf16 %v1204_v20, %v1203_v19 }
 0x213   : > { %3321 = vmatprep.mubr.bf16.mxu1 %v1237_v22  ;;  %3420 = vmatpush3.bf16.msra.mxu1 %v3681_v5  ;;  %v1267_v22 = vld [vmem:[#allocation10 + $0x60] sm:$0xff] }
 0x214   : > { %3322 = vmatmul.mubr.bf16.gmra.mxu1 %v1238_v23  ;;  %v1270_v23 = vld [vmem:[#allocation10 + $0x78] sm:$0xff] }
 0x25c   : > { %v3263_v27 = vpop.f32.mrf.mxu1 }
 0x25d   : > { %v1410_v36 = vadd.f32 %v3263_v27, %v1257_v31 }
 0x25e   : > { %v1401_v28 = vpop.f32.mrf.mxu1 }
 0x25f   : > { %v1402_v34 = vadd.f32 %v1401_v28, %v1255_v29  ;;  %v1658_v45 = vmax.f32 %v1410_v36, 0.0  ;;  %v1268_v28 = vld [vmem:[#allocation10 + $0x68] sm:$0xff] }
 0x260   : > { %v3264_v32 = vpop.f32.mrf.mxu1 }
 0x261   : > { %v1413_v35 = vadd.f32 %v3264_v32, %v1258_v30  ;;  %v1656_v43 = vmax.f32 %v1402_v34, 0.0 }
 0x262   : > { %v1404_v37 = vpop.f32.mrf.mxu1 }
 0x263   : > { %v1405_v40 = vadd.f32 %v1404_v37, %v1256_v33  ;;  %v1659_v41 = vmax.f32 %v1413_v35, 0.0 }
 0x264   : > { %v3267_v42 = vpop.f32.mrf.mxu1 }
 0x265   : > { %v1657_v44 = vmax.f32 %v1405_v40, 0.0  ;;  %v1721_v52 = vpack.c.bf16 %v1659_v41, %v1658_v45  ;;  %v1426_v57 = vadd.f32 %v3267_v42, %v1261_v50  ;;  %v1271_v40 = vld [vmem:[#allocation10 + $0x80] sm:$0xff]  ;;  %v1274_v41 = vld [vmem:[#allocation10 + $0x98] sm:$0xff]  ;;  %v1273_v42 = vld [vmem:[#allocation10 + $0x90] sm:$0xff] }
 0x266   : > { %v1417_v46 = vpop.f32.mrf.mxu1 }
 0x267   : > { %v1720_v51 = vpack.c.bf16 %v1657_v44, %v1656_v43  ;;  %v1418_v55 = vadd.f32 %v1417_v46, %v1259_v47  ;;  %v1662_v1 = vmax.f32 %v1426_v57, 0.0  ;;  %v1272_v46 = vld [vmem:[#allocation10 + $0x88] sm:$0xff] }
 0x268   : > { %v3268_v53 = vpop.f32.mrf.mxu1 }
 0x269   : > { %v1429_v56 = vadd.f32 %v3268_v53, %v1262_v48  ;;  %3341 = vmatprep.mubr.bf16.mxu0 %v1720_v51  ;;  %v1660_v63 = vmax.f32 %v1418_v55, 0.0 }
 0x26a   : > { %v1420_v58 = vpop.f32.mrf.mxu1  ;;  %3342 = vmatmul.mubr.bf16.vlgmr.msra.gmra.mxu0 %v1721_v52 }
 0x26b   : > { %v1421_v60 = vadd.f32 %v1420_v58, %v1260_v54  ;;  %v1663_v61 = vmax.f32 %v1429_v56, 0.0  ;;  %v1275_v58 = vld [vmem:[#allocation10 + $0xa0] sm:$0xff] }
 0x26c   : > { %v3271_v62 = vpop.f32.mrf.mxu1 }
 0x26d   : > { %v1661_v0 = vmax.f32 %v1421_v60, 0.0  ;;  %v1723_v8 = vpack.c.bf16 %v1663_v61, %v1662_v1  ;;  %v1442_v13 = vadd.f32 %v3271_v62, %v1265_v6  ;;  %v1277_v61 = vld [vmem:[#allocation10 + $0xb0] sm:$0xff] }
 0x26e   : > { %v1433_v2 = vpop.f32.mrf.mxu1 }
 0x26f   : > { %v1722_v7 = vpack.c.bf16 %v1661_v0, %v1660_v63  ;;  %v1434_v11 = vadd.f32 %v1433_v2, %v1263_v3  ;;  %v1666_v20 = vmax.f32 %v1442_v13, 0.0  ;;  %v1276_v0 = vld [vmem:[#allocation10 + $0xa8] sm:$0xff]  ;;  %v1282_v13 = vld [vmem:[#allocation10 + $0xd8] sm:$0xff] }
 0x270   : > { %v3272_v9 = vpop.f32.mrf.mxu1 }
 0x271   : > { %v1445_v12 = vadd.f32 %v3272_v9, %v1266_v4  ;;  %3345 = vmatprep.mubr.bf16.mxu0 %v1722_v7  ;;  %v1664_v18 = vmax.f32 %v1434_v11, 0.0 }
 0x272   : > { %v1436_v14 = vpop.f32.mrf.mxu1  ;;  %3346 = vmatmul.mubr.bf16.gmra.mxu0 %v1723_v8 }
 0x273   : > { %v1437_v15 = vadd.f32 %v1436_v14, %v1264_v10  ;;  %v1667_v16 = vmax.f32 %v1445_v12, 0.0  ;;  %v1279_v12 = vld [vmem:[#allocation10 + $0xc0] sm:$0xff] }
 0x274   : > { %v3275_v17 = vpop.f32.mrf.mxu1 }
 0x275   : > { %v1665_v19 = vmax.f32 %v1437_v15, 0.0  ;;  %v1725_v26 = vpack.c.bf16 %v1667_v16, %v1666_v20  ;;  %v1458_v31 = vadd.f32 %v3275_v17, %v1269_v24  ;;  %v1281_v15 = vld [vmem:[#allocation10 + $0xd0] sm:$0xff] }
 0x276   : > { %v1449_v21 = vpop.f32.mrf.mxu1 }
 0x277   : > { %v1724_v25 = vpack.c.bf16 %v1665_v19, %v1664_v18  ;;  %v1450_v29 = vadd.f32 %v1449_v21, %v1267_v22  ;;  %v1670_v38 = vmax.f32 %v1458_v31, 0.0  ;;  %v1280_v18 = vld [vmem:[#allocation10 + $0xc8] sm:$0xff]  ;;  %v1286_v31 = vld [vmem:[#allocation10 + $0xf8] sm:$0xff] }
 0x278   : > { %v3276_v27 = vpop.f32.mrf.mxu1 }
 0x279   : > { %v1461_v30 = vadd.f32 %v3276_v27, %v1270_v23  ;;  %3349 = vmatprep.mubr.bf16.mxu0 %v1724_v25  ;;  %v1668_v36 = vmax.f32 %v1450_v29, 0.0 }
 0x27a   : > { %v1452_v32 = vpop.f32.mrf.mxu1  ;;  %3350 = vmatmul.mubr.bf16.gmra.mxu0 %v1725_v26 }
 0x27b   : > { %v1453_v33 = vadd.f32 %v1452_v32, %v1268_v28  ;;  %v1671_v34 = vmax.f32 %v1461_v30, 0.0  ;;  %v1283_v30 = vld [vmem:[#allocation10 + $0xe0] sm:$0xff] }
 0x27c   : > { %v3279_v35 = vpop.f32.mrf.mxu1 }
 0x27d   : > { %v1669_v37 = vmax.f32 %v1453_v33, 0.0  ;;  %v1727_v44 = vpack.c.bf16 %v1671_v34, %v1670_v38  ;;  %v1474_v49 = vadd.f32 %v3279_v35, %v1273_v42  ;;  %v1285_v33 = vld [vmem:[#allocation10 + $0xf0] sm:$0xff] }
 0x27e   : > { %v1465_v39 = vpop.f32.mrf.mxu1 }
 0x27f   : > { %v1726_v43 = vpack.c.bf16 %v1669_v37, %v1668_v36  ;;  %v1466_v47 = vadd.f32 %v1465_v39, %v1271_v40  ;;  %v1674_v56 = vmax.f32 %v1474_v49, 0.0  ;;  %v1284_v36 = vld [vmem:[#allocation10 + $0xe8] sm:$0xff]  ;;  %v1290_v49 = vld [vmem:[#allocation10 + $0x118] sm:$0xff] }
 0x280   : > { %v3280_v45 = vpop.f32.mrf.mxu1 }
 0x281   : > { %v1477_v48 = vadd.f32 %v3280_v45, %v1274_v41  ;;  %3353 = vmatprep.mubr.bf16.mxu0 %v1726_v43  ;;  %v1672_v54 = vmax.f32 %v1466_v47, 0.0 }
 0x282   : > { %v1468_v50 = vpop.f32.mrf.mxu1  ;;  %3354 = vmatmul.mubr.bf16.gmra.mxu0 %v1727_v44 }
 0x283   : > { %v1469_v51 = vadd.f32 %v1468_v50, %v1272_v46  ;;  %v1675_v52 = vmax.f32 %v1477_v48, 0.0  ;;  %v1287_v48 = vld [vmem:[#allocation10 + $0x100] sm:$0xff] }
 0x284   : > { %v3283_v53 = vpop.f32.mrf.mxu1 }
 0x285   : > { %v1673_v55 = vmax.f32 %v1469_v51, 0.0  ;;  %v1729_v62 = vpack.c.bf16 %v1675_v52, %v1674_v56  ;;  %v1490_v3 = vadd.f32 %v3283_v53, %v1277_v61  ;;  %v1289_v51 = vld [vmem:[#allocation10 + $0x110] sm:$0xff] }
 0x286   : > { %v1481_v57 = vpop.f32.mrf.mxu1 }
 0x287   : > { %v1728_v60 = vpack.c.bf16 %v1673_v55, %v1672_v54  ;;  %v1482_v1 = vadd.f32 %v1481_v57, %v1275_v58  ;;  %v1678_v10 = vmax.f32 %v1490_v3, 0.0  ;;  %v1288_v54 = vld [vmem:[#allocation10 + $0x108] sm:$0xff]  ;;  %v1294_v3 = vld [vmem:[#allocation10 + $0x138] sm:$0xff] }
 0x288   : > { %v3284_v63 = vpop.f32.mrf.mxu1 }
 0x289   : > { %v1493_v2 = vadd.f32 %v3284_v63, %v1278_v59  ;;  %3357 = vmatprep.mubr.bf16.mxu0 %v1728_v60  ;;  %v1676_v8 = vmax.f32 %v1482_v1, 0.0 }
 0x28a   : > { %v1484_v4 = vpop.f32.mrf.mxu1  ;;  %3358 = vmatmul.mubr.bf16.gmra.mxu0 %v1729_v62 }
 0x28b   : > { %v1485_v5 = vadd.f32 %v1484_v4, %v1276_v0  ;;  %v1679_v6 = vmax.f32 %v1493_v2, 0.0  ;;  %v1291_v2 = vld [vmem:[#allocation10 + $0x120] sm:$0xff] }
 0x28c   : > { %v3287_v7 = vpop.f32.mrf.mxu1 }
 0x28d   : > { %v1677_v9 = vmax.f32 %v1485_v5, 0.0  ;;  %v1731_v16 = vpack.c.bf16 %v1679_v6, %v1678_v10  ;;  %v1506_v21 = vadd.f32 %v3287_v7, %v1281_v15  ;;  %v1293_v5 = vld [vmem:[#allocation10 + $0x130] sm:$0xff] }
 0x28e   : > { %v1497_v11 = vpop.f32.mrf.mxu1 }
 0x28f   : > { %v1730_v14 = vpack.c.bf16 %v1677_v9, %v1676_v8  ;;  %v1498_v19 = vadd.f32 %v1497_v11, %v1279_v12  ;;  %v1682_v28 = vmax.f32 %v1506_v21, 0.0  ;;  %v1292_v8 = vld [vmem:[#allocation10 + $0x128] sm:$0xff]  ;;  %v1298_v21 = vld [vmem:[#allocation10 + $0x158] sm:$0xff] }
 0x290   : > { %v3288_v17 = vpop.f32.mrf.mxu1 }
 0x291   : > { %v1509_v20 = vadd.f32 %v3288_v17, %v1282_v13  ;;  %3361 = vmatprep.mubr.bf16.mxu0 %v1730_v14  ;;  %v1680_v26 = vmax.f32 %v1498_v19, 0.0 }
 0x292   : > { %v1500_v22 = vpop.f32.mrf.mxu1  ;;  %3362 = vmatmul.mubr.bf16.gmra.mxu0 %v1731_v16 }
 0x293   : > { %v1501_v23 = vadd.f32 %v1500_v22, %v1280_v18  ;;  %v1683_v24 = vmax.f32 %v1509_v20, 0.0  ;;  %v1295_v20 = vld [vmem:[#allocation10 + $0x140] sm:$0xff] }
 0x294   : > { %v3291_v25 = vpop.f32.mrf.mxu1 }
 0x295   : > { %v1681_v27 = vmax.f32 %v1501_v23, 0.0  ;;  %v1733_v34 = vpack.c.bf16 %v1683_v24, %v1682_v28  ;;  %v1522_v39 = vadd.f32 %v3291_v25, %v1285_v33  ;;  %v1297_v23 = vld [vmem:[#allocation10 + $0x150] sm:$0xff] }
 0x296   : > { %v1513_v29 = vpop.f32.mrf.mxu1 }
 0x297   : > { %v1732_v32 = vpack.c.bf16 %v1681_v27, %v1680_v26  ;;  %v1514_v37 = vadd.f32 %v1513_v29, %v1283_v30  ;;  %v1686_v46 = vmax.f32 %v1522_v39, 0.0  ;;  %v1296_v26 = vld [vmem:[#allocation10 + $0x148] sm:$0xff]  ;;  %v1302_v39 = vld [vmem:[#allocation10 + $0x178] sm:$0xff] }
 0x298   : > { %v3292_v35 = vpop.f32.mrf.mxu1 }
 0x299   : > { %v1525_v38 = vadd.f32 %v3292_v35, %v1286_v31  ;;  %3365 = vmatprep.mubr.bf16.mxu0 %v1732_v32  ;;  %v1684_v44 = vmax.f32 %v1514_v37, 0.0 }
 0x29a   : > { %v1516_v40 = vpop.f32.mrf.mxu1  ;;  %3366 = vmatmul.mubr.bf16.gmra.mxu0 %v1733_v34 }
 0x29b   : > { %v1517_v41 = vadd.f32 %v1516_v40, %v1284_v36  ;;  %v1687_v42 = vmax.f32 %v1525_v38, 0.0  ;;  %v1299_v38 = vld [vmem:[#allocation10 + $0x160] sm:$0xff] }
 0x29c   : > { %v3295_v43 = vpop.f32.mrf.mxu1 }
 0x29d   : > { %v1685_v45 = vmax.f32 %v1517_v41, 0.0  ;;  %v1735_v52 = vpack.c.bf16 %v1687_v42, %v1686_v46  ;;  %v1538_v57 = vadd.f32 %v3295_v43, %v1289_v51  ;;  %v1301_v41 = vld [vmem:[#allocation10 + $0x170] sm:$0xff] }
 0x29e   : > { %v1529_v47 = vpop.f32.mrf.mxu1 }
 0x29f   : > { %v1734_v50 = vpack.c.bf16 %v1685_v45, %v1684_v44  ;;  %v1530_v55 = vadd.f32 %v1529_v47, %v1287_v48  ;;  %v1690_v0 = vmax.f32 %v1538_v57, 0.0  ;;  %v1300_v44 = vld [vmem:[#allocation10 + $0x168] sm:$0xff]  ;;  %v1306_v57 = vld [vmem:[#allocation10 + $0x198] sm:$0xff] }
 0x2a0   : > { %v3296_v53 = vpop.f32.mrf.mxu1 }
 0x2a1   : > { %v1541_v56 = vadd.f32 %v3296_v53, %v1290_v49  ;;  %3369 = vmatprep.mubr.bf16.mxu0 %v1734_v50  ;;  %v1688_v62 = vmax.f32 %v1530_v55, 0.0 }
 0x2a2   : > { %v1532_v58 = vpop.f32.mrf.mxu1  ;;  %3370 = vmatmul.mubr.bf16.gmra.mxu0 %v1735_v52 }
 0x2a3   : > { %v1533_v59 = vadd.f32 %v1532_v58, %v1288_v54  ;;  %v1691_v60 = vmax.f32 %v1541_v56, 0.0  ;;  %v1303_v56 = vld [vmem:[#allocation10 + $0x180] sm:$0xff] }
 0x2a4   : > { %v3299_v61 = vpop.f32.mrf.mxu1 }
 0x2a5   : > { %v1689_v63 = vmax.f32 %v1533_v59, 0.0  ;;  %v1737_v6 = vpack.c.bf16 %v1691_v60, %v1690_v0  ;;  %v1554_v11 = vadd.f32 %v3299_v61, %v1293_v5  ;;  %v1305_v59 = vld [vmem:[#allocation10 + $0x190] sm:$0xff] }
 0x2a6   : > { %v1545_v1 = vpop.f32.mrf.mxu1 }
 0x2a7   : > { %v1736_v4 = vpack.c.bf16 %v1689_v63, %v1688_v62  ;;  %v1546_v9 = vadd.f32 %v1545_v1, %v1291_v2  ;;  %v1694_v18 = vmax.f32 %v1554_v11, 0.0  ;;  %v1304_v62 = vld [vmem:[#allocation10 + $0x188] sm:$0xff]  ;;  %v1310_v11 = vld [vmem:[#allocation10 + $0x1b8] sm:$0xff] }
 0x2a8   : > { %v3300_v7 = vpop.f32.mrf.mxu1 }
 0x2a9   : > { %v1557_v10 = vadd.f32 %v3300_v7, %v1294_v3  ;;  %3373 = vmatprep.mubr.bf16.mxu0 %v1736_v4  ;;  %v1692_v16 = vmax.f32 %v1546_v9, 0.0 }
 0x2aa   : > { %v1548_v12 = vpop.f32.mrf.mxu1  ;;  %3374 = vmatmul.mubr.bf16.gmra.mxu0 %v1737_v6 }
 0x2ab   : > { %v1549_v13 = vadd.f32 %v1548_v12, %v1292_v8  ;;  %v1695_v14 = vmax.f32 %v1557_v10, 0.0  ;;  %v1307_v10 = vld [vmem:[#allocation10 + $0x1a0] sm:$0xff] }
 0x2ac   : > { %v3303_v15 = vpop.f32.mrf.mxu1 }
 0x2ad   : > { %v1693_v17 = vmax.f32 %v1549_v13, 0.0  ;;  %v1739_v24 = vpack.c.bf16 %v1695_v14, %v1694_v18  ;;  %v1570_v29 = vadd.f32 %v3303_v15, %v1297_v23  ;;  %v1309_v13 = vld [vmem:[#allocation10 + $0x1b0] sm:$0xff] }
 0x2ae   : > { %v1561_v19 = vpop.f32.mrf.mxu1 }
 0x2af   : > { %v1738_v22 = vpack.c.bf16 %v1693_v17, %v1692_v16  ;;  %v1562_v27 = vadd.f32 %v1561_v19, %v1295_v20  ;;  %v1698_v36 = vmax.f32 %v1570_v29, 0.0  ;;  %v1308_v16 = vld [vmem:[#allocation10 + $0x1a8] sm:$0xff]  ;;  %v1314_v29 = vld [vmem:[#allocation10 + $0x1d8] sm:$0xff] }
 0x2b0   : > { %v3304_v25 = vpop.f32.mrf.mxu1 }
 0x2b1   : > { %v1573_v28 = vadd.f32 %v3304_v25, %v1298_v21  ;;  %3377 = vmatprep.mubr.bf16.mxu0 %v1738_v22  ;;  %v1696_v34 = vmax.f32 %v1562_v27, 0.0 }
 0x2b2   : > { %v1564_v30 = vpop.f32.mrf.mxu1  ;;  %3378 = vmatmul.mubr.bf16.gmra.mxu0 %v1739_v24 }
 0x2b3   : > { %v1565_v31 = vadd.f32 %v1564_v30, %v1296_v26  ;;  %v1699_v32 = vmax.f32 %v1573_v28, 0.0  ;;  %v1311_v28 = vld [vmem:[#allocation10 + $0x1c0] sm:$0xff] }
 0x2b4   : > { %v3307_v33 = vpop.f32.mrf.mxu1 }
 0x2b5   : > { %v1697_v35 = vmax.f32 %v1565_v31, 0.0  ;;  %v1741_v42 = vpack.c.bf16 %v1699_v32, %v1698_v36  ;;  %v1586_v47 = vadd.f32 %v3307_v33, %v1301_v41  ;;  %v1313_v31 = vld [vmem:[#allocation10 + $0x1d0] sm:$0xff] }
 0x2b6   : > { %v1577_v37 = vpop.f32.mrf.mxu1 }
 0x2b7   : > { %v1740_v40 = vpack.c.bf16 %v1697_v35, %v1696_v34  ;;  %v1578_v45 = vadd.f32 %v1577_v37, %v1299_v38  ;;  %v1702_v54 = vmax.f32 %v1586_v47, 0.0  ;;  %v1312_v34 = vld [vmem:[#allocation10 + $0x1c8] sm:$0xff]  ;;  %v1318_v47 = vld [vmem:[#allocation10 + $0x1f8] sm:$0xff] }
 0x2b8   : > { %v3308_v43 = vpop.f32.mrf.mxu1 }
 0x2b9   : > { %v1589_v46 = vadd.f32 %v3308_v43, %v1302_v39  ;;  %3381 = vmatprep.mubr.bf16.mxu0 %v1740_v40  ;;  %v1700_v52 = vmax.f32 %v1578_v45, 0.0 }
 0x2ba   : > { %v1580_v48 = vpop.f32.mrf.mxu1  ;;  %3382 = vmatmul.mubr.bf16.gmra.mxu0 %v1741_v42 }
 0x2bb   : > { %v1581_v49 = vadd.f32 %v1580_v48, %v1300_v44  ;;  %v1703_v50 = vmax.f32 %v1589_v46, 0.0  ;;  %v1315_v46 = vld [vmem:[#allocation10 + $0x1e0] sm:$0xff] }
 0x2bc   : > { %v3311_v51 = vpop.f32.mrf.mxu1 }
 0x2bd   : > { %v1701_v53 = vmax.f32 %v1581_v49, 0.0  ;;  %v1743_v60 = vpack.c.bf16 %v1703_v50, %v1702_v54  ;;  %v1602_v1 = vadd.f32 %v3311_v51, %v1305_v59  ;;  %v1317_v49 = vld [vmem:[#allocation10 + $0x1f0] sm:$0xff] }
 0x2be   : > { %v1593_v55 = vpop.f32.mrf.mxu1 }
 0x2bf   : > { %v1742_v58 = vpack.c.bf16 %v1701_v53, %v1700_v52  ;;  %v1594_v63 = vadd.f32 %v1593_v55, %v1303_v56  ;;  %v1706_v8 = vmax.f32 %v1602_v1, 0.0  ;;  %v1316_v52 = vld [vmem:[#allocation10 + $0x1e8] sm:$0xff] }
 0x2c0   : > { %v3312_v61 = vpop.f32.mrf.mxu1 }
 0x2c1   : > { %v1605_v0 = vadd.f32 %v3312_v61, %v1306_v57  ;;  %3385 = vmatprep.mubr.bf16.mxu0 %v1742_v58  ;;  %v1704_v6 = vmax.f32 %v1594_v63, 0.0 }
 0x2c2   : > { %v1596_v2 = vpop.f32.mrf.mxu1  ;;  %3386 = vmatmul.mubr.bf16.gmra.mxu0 %v1743_v60 }
 0x2c3   : > { %v1597_v3 = vadd.f32 %v1596_v2, %v1304_v62  ;;  %v1707_v4 = vmax.f32 %v1605_v0, 0.0  ;;  %v1768_v2 = vld [vmem:[#allocation13] sm:$0xff] }
 0x2c4   : > { %v3315_v5 = vpop.f32.mrf.mxu1 }
 0x2c5   : > { %v1705_v7 = vmax.f32 %v1597_v3, 0.0  ;;  %v1745_v14 = vpack.c.bf16 %v1707_v4, %v1706_v8  ;;  %v1618_v19 = vadd.f32 %v3315_v5, %v1309_v13  ;;  %v1771_v3 = vld [vmem:[#allocation13 + $0x18] sm:$0xff]  ;;  %v1770_v4 = vld [vmem:[#allocation13 + $0x10] sm:$0xff] }
 0x2c6   : > { %v1609_v9 = vpop.f32.mrf.mxu1 }
 0x2c7   : > { %v1744_v12 = vpack.c.bf16 %v1705_v7, %v1704_v6  ;;  %v1610_v17 = vadd.f32 %v1609_v9, %v1307_v10  ;;  %v1710_v26 = vmax.f32 %v1618_v19, 0.0  ;;  %v1769_v6 = vld [vmem:[#allocation13 + $0x8] sm:$0xff]  ;;  %v1775_v19 = vld [vmem:[#allocation13 + $0x38] sm:$0xff] }
 0x2c8   : > { %v3316_v15 = vpop.f32.mrf.mxu1 }
 0x2c9   : > { %v1621_v18 = vadd.f32 %v3316_v15, %v1310_v11  ;;  %3389 = vmatprep.mubr.bf16.mxu0 %v1744_v12  ;;  %v1708_v24 = vmax.f32 %v1610_v17, 0.0 }
 0x2ca   : > { %v1612_v20 = vpop.f32.mrf.mxu1  ;;  %3390 = vmatmul.mubr.bf16.gmra.mxu0 %v1745_v14 }
 0x2cb   : > { %v1613_v21 = vadd.f32 %v1612_v20, %v1308_v16  ;;  %v1711_v22 = vmax.f32 %v1621_v18, 0.0  ;;  %v1772_v18 = vld [vmem:[#allocation13 + $0x20] sm:$0xff] }
 0x2cc   : > { %v3319_v23 = vpop.f32.mrf.mxu1 }
 0x2cd   : > { %v1709_v25 = vmax.f32 %v1613_v21, 0.0  ;;  %v1747_v32 = vpack.c.bf16 %v1711_v22, %v1710_v26  ;;  %v1634_v37 = vadd.f32 %v3319_v23, %v1313_v31  ;;  %v1774_v21 = vld [vmem:[#allocation13 + $0x30] sm:$0xff] }
 0x2ce   : > { %v1625_v27 = vpop.f32.mrf.mxu1 }
 0x2cf   : > { %v1746_v30 = vpack.c.bf16 %v1709_v25, %v1708_v24  ;;  %v1626_v35 = vadd.f32 %v1625_v27, %v1311_v28  ;;  %v1714_v44 = vmax.f32 %v1634_v37, 0.0  ;;  %v1773_v24 = vld [vmem:[#allocation13 + $0x28] sm:$0xff]  ;;  %v1779_v37 = vld [vmem:[#allocation13 + $0x58] sm:$0xff] }
 0x2d0   : > { %v3320_v33 = vpop.f32.mrf.mxu1 }
 0x2d1   : > { %v1637_v36 = vadd.f32 %v3320_v33, %v1314_v29  ;;  %3393 = vmatprep.mubr.bf16.mxu0 %v1746_v30  ;;  %v1712_v42 = vmax.f32 %v1626_v35, 0.0 }
 0x2d2   : > { %v1628_v38 = vpop.f32.mrf.mxu1  ;;  %3394 = vmatmul.mubr.bf16.gmra.mxu0 %v1747_v32 }
 0x2d3   : > { %v1629_v39 = vadd.f32 %v1628_v38, %v1312_v34  ;;  %v1715_v40 = vmax.f32 %v1637_v36, 0.0  ;;  %v1776_v36 = vld [vmem:[#allocation13 + $0x40] sm:$0xff] }
 0x2d4   : > { %v3323_v41 = vpop.f32.mrf.mxu1 }
 0x2d5   : > { %v1713_v43 = vmax.f32 %v1629_v39, 0.0  ;;  %v1749_v50 = vpack.c.bf16 %v1715_v40, %v1714_v44  ;;  %v1650_v55 = vadd.f32 %v3323_v41, %v1317_v49  ;;  %v1778_v39 = vld [vmem:[#allocation13 + $0x50] sm:$0xff] }
 0x2d6   : > { %v1641_v45 = vpop.f32.mrf.mxu1 }
 0x2d7   : > { %v1748_v48 = vpack.c.bf16 %v1713_v43, %v1712_v42  ;;  %v1642_v53 = vadd.f32 %v1641_v45, %v1315_v46  ;;  %v1718_v61 = vmax.f32 %v1650_v55, 0.0  ;;  %v1777_v42 = vld [vmem:[#allocation13 + $0x48] sm:$0xff]  ;;  %v1783_v55 = vld [vmem:[#allocation13 + $0x78] sm:$0xff] }
 0x2d8   : > { %v3324_v51 = vpop.f32.mrf.mxu1 }
 0x2d9   : > { %v1653_v54 = vadd.f32 %v3324_v51, %v1318_v47  ;;  %3397 = vmatprep.mubr.bf16.mxu0 %v1748_v48  ;;  %v1716_v59 = vmax.f32 %v1642_v53, 0.0 }
 0x2da   : > { %v1644_v56 = vpop.f32.mrf.mxu1  ;;  %3398 = vmatmul.mubr.bf16.gmra.mxu0 %v1749_v50 }
 0x2db   : > { %v1645_v57 = vadd.f32 %v1644_v56, %v1316_v52  ;;  %v1719_v58 = vmax.f32 %v1653_v54, 0.0  ;;  %v1780_v54 = vld [vmem:[#allocation13 + $0x60] sm:$0xff] }
 0x2dd   : > { %v1717_v60 = vmax.f32 %v1645_v57, 0.0  ;;  %v1751_v63 = vpack.c.bf16 %v1719_v58, %v1718_v61  ;;  %v1782_v57 = vld [vmem:[#allocation13 + $0x70] sm:$0xff] }
 0x2df   : > { %v1750_v62 = vpack.c.bf16 %v1717_v60, %v1716_v59  ;;  %v1781_v60 = vld [vmem:[#allocation13 + $0x68] sm:$0xff] }
 0x2e1   : > { %3401 = vmatprep.mubr.bf16.mxu0 %v1750_v62 }
 0x2e2   : > { %3402 = vmatmul.mubr.bf16.gmra.mxu0 %v1751_v63 }
 0x32a   : > { %v3343_v0 = vpop.f32.mrf.mxu0 }
 0x32b   : > { %v1923_v9 = vadd.f32 %v3343_v0, %v1770_v4 }
 0x32c   : > { %v1914_v1 = vpop.f32.mrf.mxu0 }
 0x32d   : > { %v1915_v7 = vadd.f32 %v1914_v1, %v1768_v2  ;;  %v2171_v16 = vmax.f32 %v1923_v9, 0.0  ;;  %v1787_v9 = vld [vmem:[#allocation13 + $0x98] sm:$0xff] }
 0x32e   : > { %v3344_v5 = vpop.f32.mrf.mxu0 }
 0x32f   : > { %v1926_v8 = vadd.f32 %v3344_v5, %v1771_v3  ;;  %v2169_v14 = vmax.f32 %v1915_v7, 0.0 }
 0x330   : > { %v1917_v10 = vpop.f32.mrf.mxu0 }
 0x331   : > { %v1918_v11 = vadd.f32 %v1917_v10, %v1769_v6  ;;  %v2172_v12 = vmax.f32 %v1926_v8, 0.0  ;;  %v1784_v8 = vld [vmem:[#allocation13 + $0x80] sm:$0xff] }
 0x332   : > { %v3347_v13 = vpop.f32.mrf.mxu0 }
 0x333   : > { %v2170_v15 = vmax.f32 %v1918_v11, 0.0  ;;  %v2234_v22 = vpack.c.bf16 %v2172_v12, %v2171_v16  ;;  %v1939_v27 = vadd.f32 %v3347_v13, %v1774_v21  ;;  %v1786_v11 = vld [vmem:[#allocation13 + $0x90] sm:$0xff] }
 0x334   : > { %v1930_v17 = vpop.f32.mrf.mxu0 }
 0x335   : > { %v2233_v20 = vpack.c.bf16 %v2170_v15, %v2169_v14  ;;  %v1931_v25 = vadd.f32 %v1930_v17, %v1772_v18  ;;  %v2175_v34 = vmax.f32 %v1939_v27, 0.0  ;;  %v1785_v14 = vld [vmem:[#allocation13 + $0x88] sm:$0xff]  ;;  %v1791_v27 = vld [vmem:[#allocation13 + $0xb8] sm:$0xff] }
 0x336   : > { %v3348_v23 = vpop.f32.mrf.mxu0 }
 0x337   : > { %v1942_v26 = vadd.f32 %v3348_v23, %v1775_v19  ;;  %3421 = vmatprep.mubr.bf16.mxu1 %v2233_v20  ;;  %v2173_v32 = vmax.f32 %v1931_v25, 0.0 }
 0x338   : > { %v1933_v28 = vpop.f32.mrf.mxu0  ;;  %3422 = vmatmul.mubr.bf16.vlgmr.msra.gmra.mxu1 %v2234_v22 }
 0x339   : > { %v1934_v29 = vadd.f32 %v1933_v28, %v1773_v24  ;;  %v2176_v30 = vmax.f32 %v1942_v26, 0.0  ;;  %v1788_v26 = vld [vmem:[#allocation13 + $0xa0] sm:$0xff] }
 0x33a   : > { %v3351_v31 = vpop.f32.mrf.mxu0 }
 0x33b   : > { %v2174_v33 = vmax.f32 %v1934_v29, 0.0  ;;  %v2236_v40 = vpack.c.bf16 %v2176_v30, %v2175_v34  ;;  %v1955_v45 = vadd.f32 %v3351_v31, %v1778_v39  ;;  %v1790_v29 = vld [vmem:[#allocation13 + $0xb0] sm:$0xff] }
 0x33c   : > { %v1946_v35 = vpop.f32.mrf.mxu0 }
 0x33d   : > { %v2235_v38 = vpack.c.bf16 %v2174_v33, %v2173_v32  ;;  %v1947_v43 = vadd.f32 %v1946_v35, %v1776_v36  ;;  %v2179_v52 = vmax.f32 %v1955_v45, 0.0  ;;  %v1789_v32 = vld [vmem:[#allocation13 + $0xa8] sm:$0xff]  ;;  %v1795_v45 = vld [vmem:[#allocation13 + $0xd8] sm:$0xff] }
 0x33e   : > { %v3352_v41 = vpop.f32.mrf.mxu0 }
 0x33f   : > { %v1958_v44 = vadd.f32 %v3352_v41, %v1779_v37  ;;  %3425 = vmatprep.mubr.bf16.mxu1 %v2235_v38  ;;  %v2177_v50 = vmax.f32 %v1947_v43, 0.0 }
 0x340   : > { %v1949_v46 = vpop.f32.mrf.mxu0  ;;  %3426 = vmatmul.mubr.bf16.gmra.mxu1 %v2236_v40 }
 0x341   : > { %v1950_v47 = vadd.f32 %v1949_v46, %v1777_v42  ;;  %v2180_v48 = vmax.f32 %v1958_v44, 0.0  ;;  %v1792_v44 = vld [vmem:[#allocation13 + $0xc0] sm:$0xff] }
 0x342   : > { %v3355_v49 = vpop.f32.mrf.mxu0 }
 0x343   : > { %v2178_v51 = vmax.f32 %v1950_v47, 0.0  ;;  %v2238_v58 = vpack.c.bf16 %v2180_v48, %v2179_v52  ;;  %v1971_v63 = vadd.f32 %v3355_v49, %v1782_v57  ;;  %v1794_v47 = vld [vmem:[#allocation13 + $0xd0] sm:$0xff] }
 0x344   : > { %v1962_v53 = vpop.f32.mrf.mxu0 }
 0x345   : > { %v2237_v56 = vpack.c.bf16 %v2178_v51, %v2177_v50  ;;  %v1963_v61 = vadd.f32 %v1962_v53, %v1780_v54  ;;  %v2183_v6 = vmax.f32 %v1971_v63, 0.0  ;;  %v1793_v50 = vld [vmem:[#allocation13 + $0xc8] sm:$0xff]  ;;  %v1799_v63 = vld [vmem:[#allocation13 + $0xf8] sm:$0xff] }
 0x346   : > { %v3356_v59 = vpop.f32.mrf.mxu0 }
 0x347   : > { %v1974_v62 = vadd.f32 %v3356_v59, %v1783_v55  ;;  %3429 = vmatprep.mubr.bf16.mxu1 %v2237_v56  ;;  %v2181_v4 = vmax.f32 %v1963_v61, 0.0 }
 0x348   : > { %v1965_v0 = vpop.f32.mrf.mxu0  ;;  %3430 = vmatmul.mubr.bf16.gmra.mxu1 %v2238_v58 }
 0x349   : > { %v1966_v1 = vadd.f32 %v1965_v0, %v1781_v60  ;;  %v2184_v2 = vmax.f32 %v1974_v62, 0.0  ;;  %v1796_v62 = vld [vmem:[#allocation13 + $0xe0] sm:$0xff] }
 0x34a   : > { %v3359_v3 = vpop.f32.mrf.mxu0 }
 0x34b   : > { %v2182_v5 = vmax.f32 %v1966_v1, 0.0  ;;  %v2240_v12 = vpack.c.bf16 %v2184_v2, %v2183_v6  ;;  %v1987_v17 = vadd.f32 %v3359_v3, %v1786_v11  ;;  %v1798_v1 = vld [vmem:[#allocation13 + $0xf0] sm:$0xff] }
 0x34c   : > { %v1978_v7 = vpop.f32.mrf.mxu0 }
 0x34d   : > { %v2239_v10 = vpack.c.bf16 %v2182_v5, %v2181_v4  ;;  %v1979_v15 = vadd.f32 %v1978_v7, %v1784_v8  ;;  %v2187_v24 = vmax.f32 %v1987_v17, 0.0  ;;  %v1797_v4 = vld [vmem:[#allocation13 + $0xe8] sm:$0xff]  ;;  %v1803_v17 = vld [vmem:[#allocation13 + $0x118] sm:$0xff] }
 0x34e   : > { %v3360_v13 = vpop.f32.mrf.mxu0 }
 0x34f   : > { %v1990_v16 = vadd.f32 %v3360_v13, %v1787_v9  ;;  %3433 = vmatprep.mubr.bf16.mxu1 %v2239_v10  ;;  %v2185_v22 = vmax.f32 %v1979_v15, 0.0 }
 0x350   : > { %v1981_v18 = vpop.f32.mrf.mxu0  ;;  %3434 = vmatmul.mubr.bf16.gmra.mxu1 %v2240_v12 }
 0x351   : > { %v1982_v19 = vadd.f32 %v1981_v18, %v1785_v14  ;;  %v2188_v20 = vmax.f32 %v1990_v16, 0.0  ;;  %v1800_v16 = vld [vmem:[#allocation13 + $0x100] sm:$0xff] }
 0x352   : > { %v3363_v21 = vpop.f32.mrf.mxu0 }
 0x353   : > { %v2186_v23 = vmax.f32 %v1982_v19, 0.0  ;;  %v2242_v30 = vpack.c.bf16 %v2188_v20, %v2187_v24  ;;  %v2003_v35 = vadd.f32 %v3363_v21, %v1790_v29  ;;  %v1802_v19 = vld [vmem:[#allocation13 + $0x110] sm:$0xff] }
 0x354   : > { %v1994_v25 = vpop.f32.mrf.mxu0 }
 0x355   : > { %v2241_v28 = vpack.c.bf16 %v2186_v23, %v2185_v22  ;;  %v1995_v33 = vadd.f32 %v1994_v25, %v1788_v26  ;;  %v2191_v42 = vmax.f32 %v2003_v35, 0.0  ;;  %v1801_v22 = vld [vmem:[#allocation13 + $0x108] sm:$0xff]  ;;  %v1807_v35 = vld [vmem:[#allocation13 + $0x138] sm:$0xff] }
 0x356   : > { %v3364_v31 = vpop.f32.mrf.mxu0 }
 0x357   : > { %v2006_v34 = vadd.f32 %v3364_v31, %v1791_v27  ;;  %3437 = vmatprep.mubr.bf16.mxu1 %v2241_v28  ;;  %v2189_v40 = vmax.f32 %v1995_v33, 0.0 }
 0x358   : > { %v1997_v36 = vpop.f32.mrf.mxu0  ;;  %3438 = vmatmul.mubr.bf16.gmra.mxu1 %v2242_v30 }
 0x359   : > { %v1998_v37 = vadd.f32 %v1997_v36, %v1789_v32  ;;  %v2192_v38 = vmax.f32 %v2006_v34, 0.0  ;;  %v1804_v34 = vld [vmem:[#allocation13 + $0x120] sm:$0xff] }
 0x35a   : > { %v3367_v39 = vpop.f32.mrf.mxu0 }
 0x35b   : > { %v2190_v41 = vmax.f32 %v1998_v37, 0.0  ;;  %v2244_v48 = vpack.c.bf16 %v2192_v38, %v2191_v42  ;;  %v2019_v53 = vadd.f32 %v3367_v39, %v1794_v47  ;;  %v1806_v37 = vld [vmem:[#allocation13 + $0x130] sm:$0xff] }
 0x35c   : > { %v2010_v43 = vpop.f32.mrf.mxu0 }
 0x35d   : > { %v2243_v46 = vpack.c.bf16 %v2190_v41, %v2189_v40  ;;  %v2011_v51 = vadd.f32 %v2010_v43, %v1792_v44  ;;  %v2195_v60 = vmax.f32 %v2019_v53, 0.0  ;;  %v1805_v40 = vld [vmem:[#allocation13 + $0x128] sm:$0xff]  ;;  %v1811_v53 = vld [vmem:[#allocation13 + $0x158] sm:$0xff] }
 0x35e   : > { %v3368_v49 = vpop.f32.mrf.mxu0 }
 0x35f   : > { %v2022_v52 = vadd.f32 %v3368_v49, %v1795_v45  ;;  %3441 = vmatprep.mubr.bf16.mxu1 %v2243_v46  ;;  %v2193_v58 = vmax.f32 %v2011_v51, 0.0 }
 0x360   : > { %v2013_v54 = vpop.f32.mrf.mxu0  ;;  %3442 = vmatmul.mubr.bf16.gmra.mxu1 %v2244_v48 }
 0x361   : > { %v2014_v55 = vadd.f32 %v2013_v54, %v1793_v50  ;;  %v2196_v56 = vmax.f32 %v2022_v52, 0.0  ;;  %v1808_v52 = vld [vmem:[#allocation13 + $0x140] sm:$0xff] }
 0x362   : > { %v3371_v57 = vpop.f32.mrf.mxu0 }
 0x363   : > { %v2194_v59 = vmax.f32 %v2014_v55, 0.0  ;;  %v2246_v2 = vpack.c.bf16 %v2196_v56, %v2195_v60  ;;  %v2035_v7 = vadd.f32 %v3371_v57, %v1798_v1  ;;  %v1810_v55 = vld [vmem:[#allocation13 + $0x150] sm:$0xff] }
 0x364   : > { %v2026_v61 = vpop.f32.mrf.mxu0 }
 0x365   : > { %v2245_v0 = vpack.c.bf16 %v2194_v59, %v2193_v58  ;;  %v2027_v5 = vadd.f32 %v2026_v61, %v1796_v62  ;;  %v2199_v14 = vmax.f32 %v2035_v7, 0.0  ;;  %v1809_v58 = vld [vmem:[#allocation13 + $0x148] sm:$0xff]  ;;  %v1815_v7 = vld [vmem:[#allocation13 + $0x178] sm:$0xff] }
 0x366   : > { %v3372_v3 = vpop.f32.mrf.mxu0 }
 0x367   : > { %v2038_v6 = vadd.f32 %v3372_v3, %v1799_v63  ;;  %3445 = vmatprep.mubr.bf16.mxu1 %v2245_v0  ;;  %v2197_v12 = vmax.f32 %v2027_v5, 0.0 }
 0x368   : > { %v2029_v8 = vpop.f32.mrf.mxu0  ;;  %3446 = vmatmul.mubr.bf16.gmra.mxu1 %v2246_v2 }
 0x369   : > { %v2030_v9 = vadd.f32 %v2029_v8, %v1797_v4  ;;  %v2200_v10 = vmax.f32 %v2038_v6, 0.0  ;;  %v1812_v6 = vld [vmem:[#allocation13 + $0x160] sm:$0xff] }
 0x36a   : > { %v3375_v11 = vpop.f32.mrf.mxu0 }
 0x36b   : > { %v2198_v13 = vmax.f32 %v2030_v9, 0.0  ;;  %v2248_v20 = vpack.c.bf16 %v2200_v10, %v2199_v14  ;;  %v2051_v25 = vadd.f32 %v3375_v11, %v1802_v19  ;;  %v1814_v9 = vld [vmem:[#allocation13 + $0x170] sm:$0xff] }
 0x36c   : > { %v2042_v15 = vpop.f32.mrf.mxu0 }
 0x36d   : > { %v2247_v18 = vpack.c.bf16 %v2198_v13, %v2197_v12  ;;  %v2043_v23 = vadd.f32 %v2042_v15, %v1800_v16  ;;  %v2203_v32 = vmax.f32 %v2051_v25, 0.0  ;;  %v1813_v12 = vld [vmem:[#allocation13 + $0x168] sm:$0xff]  ;;  %v1819_v25 = vld [vmem:[#allocation13 + $0x198] sm:$0xff] }
 0x36e   : > { %v3376_v21 = vpop.f32.mrf.mxu0 }
 0x36f   : > { %v2054_v24 = vadd.f32 %v3376_v21, %v1803_v17  ;;  %3449 = vmatprep.mubr.bf16.mxu1 %v2247_v18  ;;  %v2201_v30 = vmax.f32 %v2043_v23, 0.0 }
 0x370   : > { %v2045_v26 = vpop.f32.mrf.mxu0  ;;  %3450 = vmatmul.mubr.bf16.gmra.mxu1 %v2248_v20 }
 0x371   : > { %v2046_v27 = vadd.f32 %v2045_v26, %v1801_v22  ;;  %v2204_v28 = vmax.f32 %v2054_v24, 0.0  ;;  %v1816_v24 = vld [vmem:[#allocation13 + $0x180] sm:$0xff] }
 0x372   : > { %v3379_v29 = vpop.f32.mrf.mxu0 }
 0x373   : > { %v2202_v31 = vmax.f32 %v2046_v27, 0.0  ;;  %v2250_v38 = vpack.c.bf16 %v2204_v28, %v2203_v32  ;;  %v2067_v43 = vadd.f32 %v3379_v29, %v1806_v37  ;;  %v1818_v27 = vld [vmem:[#allocation13 + $0x190] sm:$0xff] }
 0x374   : > { %v2058_v33 = vpop.f32.mrf.mxu0 }
 0x375   : > { %v2249_v36 = vpack.c.bf16 %v2202_v31, %v2201_v30  ;;  %v2059_v41 = vadd.f32 %v2058_v33, %v1804_v34  ;;  %v2207_v50 = vmax.f32 %v2067_v43, 0.0  ;;  %v1817_v30 = vld [vmem:[#allocation13 + $0x188] sm:$0xff]  ;;  %v1823_v43 = vld [vmem:[#allocation13 + $0x1b8] sm:$0xff] }
 0x376   : > { %v3380_v39 = vpop.f32.mrf.mxu0 }
 0x377   : > { %v2070_v42 = vadd.f32 %v3380_v39, %v1807_v35  ;;  %3453 = vmatprep.mubr.bf16.mxu1 %v2249_v36  ;;  %v2205_v48 = vmax.f32 %v2059_v41, 0.0 }
 0x378   : > { %v2061_v44 = vpop.f32.mrf.mxu0  ;;  %3454 = vmatmul.mubr.bf16.gmra.mxu1 %v2250_v38 }
 0x379   : > { %v2062_v45 = vadd.f32 %v2061_v44, %v1805_v40  ;;  %v2208_v46 = vmax.f32 %v2070_v42, 0.0  ;;  %v1820_v42 = vld [vmem:[#allocation13 + $0x1a0] sm:$0xff] }
 0x37a   : > { %v3383_v47 = vpop.f32.mrf.mxu0 }
 0x37b   : > { %v2206_v49 = vmax.f32 %v2062_v45, 0.0  ;;  %v2252_v56 = vpack.c.bf16 %v2208_v46, %v2207_v50  ;;  %v2083_v61 = vadd.f32 %v3383_v47, %v1810_v55  ;;  %v1822_v45 = vld [vmem:[#allocation13 + $0x1b0] sm:$0xff] }
 0x37c   : > { %v2074_v51 = vpop.f32.mrf.mxu0 }
 0x37d   : > { %v2251_v54 = vpack.c.bf16 %v2206_v49, %v2205_v48  ;;  %v2075_v59 = vadd.f32 %v2074_v51, %v1808_v52  ;;  %v2211_v4 = vmax.f32 %v2083_v61, 0.0  ;;  %v1821_v48 = vld [vmem:[#allocation13 + $0x1a8] sm:$0xff]  ;;  %v1827_v61 = vld [vmem:[#allocation13 + $0x1d8] sm:$0xff] }
 0x37e   : > { %v3384_v57 = vpop.f32.mrf.mxu0 }
 0x37f   : > { %v2086_v60 = vadd.f32 %v3384_v57, %v1811_v53  ;;  %3457 = vmatprep.mubr.bf16.mxu1 %v2251_v54  ;;  %v2209_v2 = vmax.f32 %v2075_v59, 0.0 }
 0x380   : > { %v2077_v62 = vpop.f32.mrf.mxu0  ;;  %3458 = vmatmul.mubr.bf16.gmra.mxu1 %v2252_v56 }
 0x381   : > { %v2078_v63 = vadd.f32 %v2077_v62, %v1809_v58  ;;  %v2212_v0 = vmax.f32 %v2086_v60, 0.0  ;;  %v1824_v60 = vld [vmem:[#allocation13 + $0x1c0] sm:$0xff] }
 0x382   : > { %v3387_v1 = vpop.f32.mrf.mxu0 }
 0x383   : > { %v2210_v3 = vmax.f32 %v2078_v63, 0.0  ;;  %v2254_v10 = vpack.c.bf16 %v2212_v0, %v2211_v4  ;;  %v2099_v15 = vadd.f32 %v3387_v1, %v1814_v9  ;;  %v1826_v63 = vld [vmem:[#allocation13 + $0x1d0] sm:$0xff] }
 0x384   : > { %v2090_v5 = vpop.f32.mrf.mxu0 }
 0x385   : > { %v2253_v8 = vpack.c.bf16 %v2210_v3, %v2209_v2  ;;  %v2091_v13 = vadd.f32 %v2090_v5, %v1812_v6  ;;  %v2215_v22 = vmax.f32 %v2099_v15, 0.0  ;;  %v1825_v2 = vld [vmem:[#allocation13 + $0x1c8] sm:$0xff]  ;;  %v1831_v15 = vld [vmem:[#allocation13 + $0x1f8] sm:$0xff] }
 0x386   : > { %v3388_v11 = vpop.f32.mrf.mxu0 }
 0x387   : > { %v2102_v14 = vadd.f32 %v3388_v11, %v1815_v7  ;;  %3461 = vmatprep.mubr.bf16.mxu1 %v2253_v8  ;;  %v2213_v20 = vmax.f32 %v2091_v13, 0.0 }
 0x388   : > { %v2093_v16 = vpop.f32.mrf.mxu0  ;;  %3462 = vmatmul.mubr.bf16.gmra.mxu1 %v2254_v10 }
 0x389   : > { %v2094_v17 = vadd.f32 %v2093_v16, %v1813_v12  ;;  %v2216_v18 = vmax.f32 %v2102_v14, 0.0  ;;  %v1828_v14 = vld [vmem:[#allocation13 + $0x1e0] sm:$0xff] }
 0x38a   : > { %v3391_v19 = vpop.f32.mrf.mxu0 }
 0x38b   : > { %v2214_v21 = vmax.f32 %v2094_v17, 0.0  ;;  %v2256_v28 = vpack.c.bf16 %v2216_v18, %v2215_v22  ;;  %v2115_v33 = vadd.f32 %v3391_v19, %v1818_v27  ;;  %v1830_v17 = vld [vmem:[#allocation13 + $0x1f0] sm:$0xff] }
 0x38c   : > { %v2106_v23 = vpop.f32.mrf.mxu0 }
 0x38d   : > { %v2255_v26 = vpack.c.bf16 %v2214_v21, %v2213_v20  ;;  %v2107_v31 = vadd.f32 %v2106_v23, %v1816_v24  ;;  %v2219_v40 = vmax.f32 %v2115_v33, 0.0  ;;  %v1829_v20 = vld [vmem:[#allocation13 + $0x1e8] sm:$0xff] }
 0x38e   : > { %v3392_v29 = vpop.f32.mrf.mxu0 }
 0x38f   : > { %v2118_v32 = vadd.f32 %v3392_v29, %v1819_v25  ;;  %3465 = vmatprep.mubr.bf16.mxu1 %v2255_v26  ;;  %v2217_v38 = vmax.f32 %v2107_v31, 0.0 }
 0x390   : > { %v2109_v34 = vpop.f32.mrf.mxu0  ;;  %3466 = vmatmul.mubr.bf16.gmra.mxu1 %v2256_v28 }
 0x391   : > { %v2110_v35 = vadd.f32 %v2109_v34, %v1817_v30  ;;  %v2220_v36 = vmax.f32 %v2118_v32, 0.0  ;;  %v2283_v32 = vld [vmem:[#allocation16 + $0x10] sm:$0xff]  ;;  %v2281_v34 = vld [vmem:[#allocation16] sm:$0xff] }
 0x392   : > { %v3395_v37 = vpop.f32.mrf.mxu0 }
 0x393   : > { %v2218_v39 = vmax.f32 %v2110_v35, 0.0  ;;  %v2258_v46 = vpack.c.bf16 %v2220_v36, %v2219_v40  ;;  %v2131_v51 = vadd.f32 %v3395_v37, %v1822_v45  ;;  %v2284_v37 = vld [vmem:[#allocation16 + $0x18] sm:$0xff]  ;;  %v2282_v40 = vld [vmem:[#allocation16 + $0x8] sm:$0xff] }
 0x394   : > { %v2122_v41 = vpop.f32.mrf.mxu0 }
 0x395   : > { %v2257_v44 = vpack.c.bf16 %v2218_v39, %v2217_v38  ;;  %v2123_v49 = vadd.f32 %v2122_v41, %v1820_v42  ;;  %v2223_v58 = vmax.f32 %v2131_v51, 0.0 }
 0x396   : > { %v3396_v47 = vpop.f32.mrf.mxu0 }
 0x397   : > { %v2134_v50 = vadd.f32 %v3396_v47, %v1823_v43  ;;  %3469 = vmatprep.mubr.bf16.mxu1 %v2257_v44  ;;  %v2221_v56 = vmax.f32 %v2123_v49, 0.0  ;;  %v2287_v43 = vld [vmem:[#allocation16 + $0x30] sm:$0xff]  ;;  %v2288_v49 = vld [vmem:[#allocation16 + $0x38] sm:$0xff] }
 0x398   : > { %v2125_v52 = vpop.f32.mrf.mxu0  ;;  %3470 = vmatmul.mubr.bf16.gmra.mxu1 %v2258_v46  ;;  %v2285_v46 = vld [vmem:[#allocation16 + $0x20] sm:$0xff] }
 0x399   : > { %v2126_v53 = vadd.f32 %v2125_v52, %v1821_v48  ;;  %v2224_v54 = vmax.f32 %v2134_v50, 0.0  ;;  %v2286_v52 = vld [vmem:[#allocation16 + $0x28] sm:$0xff] }
 0x39a   : > { %v3399_v55 = vpop.f32.mrf.mxu0 }
 0x39b   : > { %v2222_v57 = vmax.f32 %v2126_v53, 0.0  ;;  %v2260_v0 = vpack.c.bf16 %v2224_v54, %v2223_v58  ;;  %v2147_v5 = vadd.f32 %v3399_v55, %v1826_v63  ;;  %v2291_v55 = vld [vmem:[#allocation16 + $0x50] sm:$0xff]  ;;  %v2289_v58 = vld [vmem:[#allocation16 + $0x40] sm:$0xff] }
 0x39c   : > { %v2138_v59 = vpop.f32.mrf.mxu0 }
 0x39d   : > { %v2259_v62 = vpack.c.bf16 %v2222_v57, %v2221_v56  ;;  %v2139_v3 = vadd.f32 %v2138_v59, %v1824_v60  ;;  %v2227_v12 = vmax.f32 %v2147_v5, 0.0 }
 0x39e   : > { %v3400_v1 = vpop.f32.mrf.mxu0 }
 0x39f   : > { %v2150_v4 = vadd.f32 %v3400_v1, %v1827_v61  ;;  %3473 = vmatprep.mubr.bf16.mxu1 %v2259_v62  ;;  %v2225_v10 = vmax.f32 %v2139_v3, 0.0  ;;  %v2292_v61 = vld [vmem:[#allocation16 + $0x58] sm:$0xff]  ;;  %v2295_v3 = vld [vmem:[#allocation16 + $0x70] sm:$0xff] }
 0x3a0   : > { %v2141_v6 = vpop.f32.mrf.mxu0  ;;  %3474 = vmatmul.mubr.bf16.gmra.mxu1 %v2260_v0  ;;  %v2290_v0 = vld [vmem:[#allocation16 + $0x48] sm:$0xff] }
 0x3a1   : > { %v2142_v7 = vadd.f32 %v2141_v6, %v1825_v2  ;;  %v2228_v8 = vmax.f32 %v2150_v4, 0.0  ;;  %v2293_v6 = vld [vmem:[#allocation16 + $0x60] sm:$0xff] }
 0x3a2   : > { %v3403_v9 = vpop.f32.mrf.mxu0 }
 0x3a3   : > { %v2226_v11 = vmax.f32 %v2142_v7, 0.0  ;;  %v2262_v18 = vpack.c.bf16 %v2228_v8, %v2227_v12  ;;  %v2163_v23 = vadd.f32 %v3403_v9, %v1830_v17  ;;  %v2296_v9 = vld [vmem:[#allocation16 + $0x78] sm:$0xff]  ;;  %v2294_v12 = vld [vmem:[#allocation16 + $0x68] sm:$0xff] }
 0x3a4   : > { %v2154_v13 = vpop.f32.mrf.mxu0 }
 0x3a5   : > { %v2261_v16 = vpack.c.bf16 %v2226_v11, %v2225_v10  ;;  %v2155_v21 = vadd.f32 %v2154_v13, %v1828_v14  ;;  %v2231_v29 = vmax.f32 %v2163_v23, 0.0 }
 0x3a6   : > { %v3404_v19 = vpop.f32.mrf.mxu0 }
 0x3a7   : > { %v2166_v22 = vadd.f32 %v3404_v19, %v1831_v15  ;;  %3477 = vmatprep.mubr.bf16.mxu1 %v2261_v16  ;;  %v2229_v27 = vmax.f32 %v2155_v21, 0.0  ;;  %v2299_v15 = vld [vmem:[#allocation16 + $0x90] sm:$0xff]  ;;  %v2300_v21 = vld [vmem:[#allocation16 + $0x98] sm:$0xff] }
 0x3a8   : > { %v2157_v24 = vpop.f32.mrf.mxu0  ;;  %3478 = vmatmul.mubr.bf16.gmra.mxu1 %v2262_v18  ;;  %v2297_v18 = vld [vmem:[#allocation16 + $0x80] sm:$0xff] }
 0x3a9   : > { %v2158_v25 = vadd.f32 %v2157_v24, %v1829_v20  ;;  %v2232_v26 = vmax.f32 %v2166_v22, 0.0  ;;  %v2298_v24 = vld [vmem:[#allocation16 + $0x88] sm:$0xff] }
 0x3ab   : > { %v2230_v28 = vmax.f32 %v2158_v25, 0.0  ;;  %v2264_v31 = vpack.c.bf16 %v2232_v26, %v2231_v29 }
 0x3ad   : > { %v2263_v30 = vpack.c.bf16 %v2230_v28, %v2229_v27  ;;  %v2303_v27 = vld [vmem:[#allocation16 + $0xb0] sm:$0xff] }
 0x3af   : > { %3481 = vmatprep.mubr.bf16.mxu1 %v2263_v30  ;;  %v2301_v30 = vld [vmem:[#allocation16 + $0xa0] sm:$0xff] }
 0x3b0   : > { %3482 = vmatmul.mubr.bf16.gmra.mxu1 %v2264_v31 }
 0x3f8   : > { %v3423_v33 = vpop.f32.mrf.mxu1 }
 0x3f9   : > { %v2436_v35 = vadd.f32 %v3423_v33, %v2283_v32  ;;  %v2304_v33 = vld [vmem:[#allocation16 + $0xb8] sm:$0xff] }
 0x3fa   : > { %v2427_v36 = vpop.f32.mrf.mxu1 }
 0x3fb   : > { %2684 = vst [vmem:[%s4341_s16 + $0x10] sm:$0xff] %v2436_v35  ;;  %v2428_v38 = vadd.f32 %v2427_v36, %v2281_v34  ;;  %v2302_v36 = vld [vmem:[#allocation16 + $0xa8] sm:$0xff] }
 0x3fc   : > { %v3424_v39 = vpop.f32.mrf.mxu1 }
 0x3fd   : > { %2682 = vst [vmem:[%s4341_s16] sm:$0xff] %v2428_v38  ;;  %v2439_v41 = vadd.f32 %v3424_v39, %v2284_v37  ;;  %v2307_v39 = vld [vmem:[#allocation16 + $0xd0] sm:$0xff] }
 0x3fe   : > { %v2430_v42 = vpop.f32.mrf.mxu1 }
 0x3ff   : > { %2685 = vst [vmem:[%s4341_s16 + $0x18] sm:$0xff] %v2439_v41  ;;  %v2431_v44 = vadd.f32 %v2430_v42, %v2282_v40  ;;  %v2305_v42 = vld [vmem:[#allocation16 + $0xc0] sm:$0xff] }
 0x400   : > { %v3427_v45 = vpop.f32.mrf.mxu1 }
 0x401   : > { %2683 = vst [vmem:[%s4341_s16 + $0x8] sm:$0xff] %v2431_v44  ;;  %v2452_v47 = vadd.f32 %v3427_v45, %v2287_v43  ;;  %v2308_v45 = vld [vmem:[#allocation16 + $0xd8] sm:$0xff] }
 0x402   : > { %v2443_v48 = vpop.f32.mrf.mxu1 }
 0x403   : > { %2688 = vst [vmem:[%s4341_s16 + $0x30] sm:$0xff] %v2452_v47  ;;  %v2444_v50 = vadd.f32 %v2443_v48, %v2285_v46  ;;  %v2306_v48 = vld [vmem:[#allocation16 + $0xc8] sm:$0xff] }
 0x404   : > { %v3428_v51 = vpop.f32.mrf.mxu1 }
 0x405   : > { %2686 = vst [vmem:[%s4341_s16 + $0x20] sm:$0xff] %v2444_v50  ;;  %v2455_v53 = vadd.f32 %v3428_v51, %v2288_v49  ;;  %v2311_v51 = vld [vmem:[#allocation16 + $0xf0] sm:$0xff] }
 0x406   : > { %v2446_v54 = vpop.f32.mrf.mxu1 }
 0x407   : > { %2689 = vst [vmem:[%s4341_s16 + $0x38] sm:$0xff] %v2455_v53  ;;  %v2447_v56 = vadd.f32 %v2446_v54, %v2286_v52  ;;  %v2309_v54 = vld [vmem:[#allocation16 + $0xe0] sm:$0xff] }
 0x408   : > { %v3431_v57 = vpop.f32.mrf.mxu1 }
 0x409   : > { %2687 = vst [vmem:[%s4341_s16 + $0x28] sm:$0xff] %v2447_v56  ;;  %v2468_v59 = vadd.f32 %v3431_v57, %v2291_v55  ;;  %v2312_v57 = vld [vmem:[#allocation16 + $0xf8] sm:$0xff] }
 0x40a   : > { %v2459_v60 = vpop.f32.mrf.mxu1 }
 0x40b   : > { %2692 = vst [vmem:[%s4341_s16 + $0x50] sm:$0xff] %v2468_v59  ;;  %v2460_v62 = vadd.f32 %v2459_v60, %v2289_v58  ;;  %v2310_v60 = vld [vmem:[#allocation16 + $0xe8] sm:$0xff] }
 0x40c   : > { %v3432_v63 = vpop.f32.mrf.mxu1 }
 0x40d   : > { %2690 = vst [vmem:[%s4341_s16 + $0x40] sm:$0xff] %v2460_v62  ;;  %v2471_v1 = vadd.f32 %v3432_v63, %v2292_v61  ;;  %v2315_v63 = vld [vmem:[#allocation16 + $0x110] sm:$0xff] }
 0x40e   : > { %v2462_v2 = vpop.f32.mrf.mxu1 }
 0x40f   : > { %2693 = vst [vmem:[%s4341_s16 + $0x58] sm:$0xff] %v2471_v1  ;;  %v2463_v4 = vadd.f32 %v2462_v2, %v2290_v0  ;;  %v2313_v2 = vld [vmem:[#allocation16 + $0x100] sm:$0xff] }
 0x410   : > { %v3435_v5 = vpop.f32.mrf.mxu1 }
 0x411   : > { %2691 = vst [vmem:[%s4341_s16 + $0x48] sm:$0xff] %v2463_v4  ;;  %v2484_v7 = vadd.f32 %v3435_v5, %v2295_v3  ;;  %v2316_v5 = vld [vmem:[#allocation16 + $0x118] sm:$0xff] }
 0x412   : > { %v2475_v8 = vpop.f32.mrf.mxu1 }
 0x413   : > { %2696 = vst [vmem:[%s4341_s16 + $0x70] sm:$0xff] %v2484_v7  ;;  %v2476_v10 = vadd.f32 %v2475_v8, %v2293_v6  ;;  %v2314_v8 = vld [vmem:[#allocation16 + $0x108] sm:$0xff] }
 0x414   : > { %v3436_v11 = vpop.f32.mrf.mxu1 }
 0x415   : > { %2694 = vst [vmem:[%s4341_s16 + $0x60] sm:$0xff] %v2476_v10  ;;  %v2487_v13 = vadd.f32 %v3436_v11, %v2296_v9  ;;  %v2319_v11 = vld [vmem:[#allocation16 + $0x130] sm:$0xff] }
 0x416   : > { %v2478_v14 = vpop.f32.mrf.mxu1 }
 0x417   : > { %2697 = vst [vmem:[%s4341_s16 + $0x78] sm:$0xff] %v2487_v13  ;;  %v2479_v16 = vadd.f32 %v2478_v14, %v2294_v12  ;;  %v2317_v14 = vld [vmem:[#allocation16 + $0x120] sm:$0xff] }
 0x418   : > { %v3439_v17 = vpop.f32.mrf.mxu1 }
 0x419   : > { %2695 = vst [vmem:[%s4341_s16 + $0x68] sm:$0xff] %v2479_v16  ;;  %v2500_v19 = vadd.f32 %v3439_v17, %v2299_v15  ;;  %v2320_v17 = vld [vmem:[#allocation16 + $0x138] sm:$0xff] }
 0x41a   : > { %v2491_v20 = vpop.f32.mrf.mxu1 }
 0x41b   : > { %2700 = vst [vmem:[%s4341_s16 + $0x90] sm:$0xff] %v2500_v19  ;;  %v2492_v22 = vadd.f32 %v2491_v20, %v2297_v18  ;;  %v2318_v20 = vld [vmem:[#allocation16 + $0x128] sm:$0xff] }
 0x41c   : > { %v3440_v23 = vpop.f32.mrf.mxu1 }
 0x41d   : > { %2698 = vst [vmem:[%s4341_s16 + $0x80] sm:$0xff] %v2492_v22  ;;  %v2503_v25 = vadd.f32 %v3440_v23, %v2300_v21  ;;  %v2323_v23 = vld [vmem:[#allocation16 + $0x150] sm:$0xff] }
 0x41e   : > { %v2494_v26 = vpop.f32.mrf.mxu1 }
 0x41f   : > { %2701 = vst [vmem:[%s4341_s16 + $0x98] sm:$0xff] %v2503_v25  ;;  %v2495_v28 = vadd.f32 %v2494_v26, %v2298_v24  ;;  %v2321_v26 = vld [vmem:[#allocation16 + $0x140] sm:$0xff] }
 0x420   : > { %v3443_v29 = vpop.f32.mrf.mxu1 }
 0x421   : > { %2699 = vst [vmem:[%s4341_s16 + $0x88] sm:$0xff] %v2495_v28  ;;  %v2516_v31 = vadd.f32 %v3443_v29, %v2303_v27  ;;  %v2324_v29 = vld [vmem:[#allocation16 + $0x158] sm:$0xff] }
 0x422   : > { %v2507_v32 = vpop.f32.mrf.mxu1 }
 0x423   : > { %2704 = vst [vmem:[%s4341_s16 + $0xb0] sm:$0xff] %v2516_v31  ;;  %v2508_v34 = vadd.f32 %v2507_v32, %v2301_v30  ;;  %v2322_v32 = vld [vmem:[#allocation16 + $0x148] sm:$0xff] }
 0x424   : > { %v3444_v35 = vpop.f32.mrf.mxu1 }
 0x425   : > { %2702 = vst [vmem:[%s4341_s16 + $0xa0] sm:$0xff] %v2508_v34  ;;  %v2519_v37 = vadd.f32 %v3444_v35, %v2304_v33  ;;  %v2327_v35 = vld [vmem:[#allocation16 + $0x170] sm:$0xff] }
 0x426   : > { %v2510_v38 = vpop.f32.mrf.mxu1 }
 0x427   : > { %2705 = vst [vmem:[%s4341_s16 + $0xb8] sm:$0xff] %v2519_v37  ;;  %v2511_v40 = vadd.f32 %v2510_v38, %v2302_v36  ;;  %v2325_v38 = vld [vmem:[#allocation16 + $0x160] sm:$0xff] }
 0x428   : > { %v3447_v41 = vpop.f32.mrf.mxu1 }
 0x429   : > { %2703 = vst [vmem:[%s4341_s16 + $0xa8] sm:$0xff] %v2511_v40  ;;  %v2532_v43 = vadd.f32 %v3447_v41, %v2307_v39  ;;  %v2328_v41 = vld [vmem:[#allocation16 + $0x178] sm:$0xff] }
 0x42a   : > { %v2523_v44 = vpop.f32.mrf.mxu1 }
 0x42b   : > { %2708 = vst [vmem:[%s4341_s16 + $0xd0] sm:$0xff] %v2532_v43  ;;  %v2524_v46 = vadd.f32 %v2523_v44, %v2305_v42  ;;  %v2326_v44 = vld [vmem:[#allocation16 + $0x168] sm:$0xff] }
 0x42c   : > { %v3448_v47 = vpop.f32.mrf.mxu1 }
 0x42d   : > { %2706 = vst [vmem:[%s4341_s16 + $0xc0] sm:$0xff] %v2524_v46  ;;  %v2535_v49 = vadd.f32 %v3448_v47, %v2308_v45  ;;  %v2331_v47 = vld [vmem:[#allocation16 + $0x190] sm:$0xff] }
 0x42e   : > { %v2526_v50 = vpop.f32.mrf.mxu1 }
 0x42f   : > { %2709 = vst [vmem:[%s4341_s16 + $0xd8] sm:$0xff] %v2535_v49  ;;  %v2527_v52 = vadd.f32 %v2526_v50, %v2306_v48  ;;  %v2329_v50 = vld [vmem:[#allocation16 + $0x180] sm:$0xff] }
 0x430   : > { %v3451_v53 = vpop.f32.mrf.mxu1 }
 0x431   : > { %2707 = vst [vmem:[%s4341_s16 + $0xc8] sm:$0xff] %v2527_v52  ;;  %v2548_v55 = vadd.f32 %v3451_v53, %v2311_v51  ;;  %v2332_v53 = vld [vmem:[#allocation16 + $0x198] sm:$0xff] }
 0x432   : > { %v2539_v56 = vpop.f32.mrf.mxu1 }
 0x433   : > { %2712 = vst [vmem:[%s4341_s16 + $0xf0] sm:$0xff] %v2548_v55  ;;  %v2540_v58 = vadd.f32 %v2539_v56, %v2309_v54  ;;  %v2330_v56 = vld [vmem:[#allocation16 + $0x188] sm:$0xff] }
 0x434   : > { %v3452_v59 = vpop.f32.mrf.mxu1 }
 0x435   : > { %2710 = vst [vmem:[%s4341_s16 + $0xe0] sm:$0xff] %v2540_v58  ;;  %v2551_v61 = vadd.f32 %v3452_v59, %v2312_v57  ;;  %v2335_v59 = vld [vmem:[#allocation16 + $0x1b0] sm:$0xff] }
 0x436   : > { %v2542_v62 = vpop.f32.mrf.mxu1 }
 0x437   : > { %2713 = vst [vmem:[%s4341_s16 + $0xf8] sm:$0xff] %v2551_v61  ;;  %v2543_v0 = vadd.f32 %v2542_v62, %v2310_v60  ;;  %v2333_v62 = vld [vmem:[#allocation16 + $0x1a0] sm:$0xff] }
 0x438   : > { %v3455_v1 = vpop.f32.mrf.mxu1 }
 0x439   : > { %2711 = vst [vmem:[%s4341_s16 + $0xe8] sm:$0xff] %v2543_v0  ;;  %v2564_v3 = vadd.f32 %v3455_v1, %v2315_v63  ;;  %v2336_v1 = vld [vmem:[#allocation16 + $0x1b8] sm:$0xff] }
 0x43a   : > { %v2555_v4 = vpop.f32.mrf.mxu1 }
 0x43b   : > { %2716 = vst [vmem:[%s4341_s16 + $0x110] sm:$0xff] %v2564_v3  ;;  %v2556_v6 = vadd.f32 %v2555_v4, %v2313_v2  ;;  %v2334_v4 = vld [vmem:[#allocation16 + $0x1a8] sm:$0xff] }
 0x43c   : > { %v3456_v7 = vpop.f32.mrf.mxu1 }
 0x43d   : > { %2714 = vst [vmem:[%s4341_s16 + $0x100] sm:$0xff] %v2556_v6  ;;  %v2567_v9 = vadd.f32 %v3456_v7, %v2316_v5  ;;  %v2339_v7 = vld [vmem:[#allocation16 + $0x1d0] sm:$0xff] }
 0x43e   : > { %v2558_v10 = vpop.f32.mrf.mxu1 }
 0x43f   : > { %2717 = vst [vmem:[%s4341_s16 + $0x118] sm:$0xff] %v2567_v9  ;;  %v2559_v12 = vadd.f32 %v2558_v10, %v2314_v8  ;;  %v2337_v10 = vld [vmem:[#allocation16 + $0x1c0] sm:$0xff] }
 0x440   : > { %v3459_v13 = vpop.f32.mrf.mxu1 }
 0x441   : > { %2715 = vst [vmem:[%s4341_s16 + $0x108] sm:$0xff] %v2559_v12  ;;  %v2580_v15 = vadd.f32 %v3459_v13, %v2319_v11  ;;  %v2340_v13 = vld [vmem:[#allocation16 + $0x1d8] sm:$0xff] }
 0x442   : > { %v2571_v16 = vpop.f32.mrf.mxu1 }
 0x443   : > { %2720 = vst [vmem:[%s4341_s16 + $0x130] sm:$0xff] %v2580_v15  ;;  %v2572_v18 = vadd.f32 %v2571_v16, %v2317_v14  ;;  %v2338_v16 = vld [vmem:[#allocation16 + $0x1c8] sm:$0xff] }
 0x444   : > { %v3460_v19 = vpop.f32.mrf.mxu1 }
 0x445   : > { %2718 = vst [vmem:[%s4341_s16 + $0x120] sm:$0xff] %v2572_v18  ;;  %v2583_v21 = vadd.f32 %v3460_v19, %v2320_v17  ;;  %v2343_v19 = vld [vmem:[#allocation16 + $0x1f0] sm:$0xff] }
 0x446   : > { %v2574_v22 = vpop.f32.mrf.mxu1 }
 0x447   : > { %2721 = vst [vmem:[%s4341_s16 + $0x138] sm:$0xff] %v2583_v21  ;;  %v2575_v24 = vadd.f32 %v2574_v22, %v2318_v20  ;;  %v2341_v22 = vld [vmem:[#allocation16 + $0x1e0] sm:$0xff] }
 0x448   : > { %v3463_v25 = vpop.f32.mrf.mxu1 }
 0x449   : > { %2719 = vst [vmem:[%s4341_s16 + $0x128] sm:$0xff] %v2575_v24  ;;  %v2596_v27 = vadd.f32 %v3463_v25, %v2323_v23  ;;  %v2344_v25 = vld [vmem:[#allocation16 + $0x1f8] sm:$0xff] }
 0x44a   : > { %v2587_v28 = vpop.f32.mrf.mxu1 }
 0x44b   : > { %2724 = vst [vmem:[%s4341_s16 + $0x150] sm:$0xff] %v2596_v27  ;;  %v2588_v30 = vadd.f32 %v2587_v28, %v2321_v26  ;;  %v2342_v28 = vld [vmem:[#allocation16 + $0x1e8] sm:$0xff] }
 0x44c   : > { %v3464_v31 = vpop.f32.mrf.mxu1 }
 0x44d   : > { %2722 = vst [vmem:[%s4341_s16 + $0x140] sm:$0xff] %v2588_v30  ;;  %v2599_v33 = vadd.f32 %v3464_v31, %v2324_v29 }
 0x44e   : > { %v2590_v34 = vpop.f32.mrf.mxu1 }
 0x44f   : > { %2725 = vst [vmem:[%s4341_s16 + $0x158] sm:$0xff] %v2599_v33  ;;  %v2591_v36 = vadd.f32 %v2590_v34, %v2322_v32 }
 0x450   : > { %v3467_v37 = vpop.f32.mrf.mxu1 }
 0x451   : > { %2723 = vst [vmem:[%s4341_s16 + $0x148] sm:$0xff] %v2591_v36  ;;  %v2612_v39 = vadd.f32 %v3467_v37, %v2327_v35 }
 0x452   : > { %v2603_v40 = vpop.f32.mrf.mxu1 }
 0x453   : > { %2728 = vst [vmem:[%s4341_s16 + $0x170] sm:$0xff] %v2612_v39  ;;  %v2604_v42 = vadd.f32 %v2603_v40, %v2325_v38 }
 0x454   : > { %v3468_v43 = vpop.f32.mrf.mxu1 }
 0x455   : > { %2726 = vst [vmem:[%s4341_s16 + $0x160] sm:$0xff] %v2604_v42  ;;  %v2615_v45 = vadd.f32 %v3468_v43, %v2328_v41 }
 0x456   : > { %v2606_v46 = vpop.f32.mrf.mxu1 }
 0x457   : > { %2729 = vst [vmem:[%s4341_s16 + $0x178] sm:$0xff] %v2615_v45  ;;  %v2607_v48 = vadd.f32 %v2606_v46, %v2326_v44 }
 0x458   : > { %v3471_v49 = vpop.f32.mrf.mxu1 }
 0x459   : > { %2727 = vst [vmem:[%s4341_s16 + $0x168] sm:$0xff] %v2607_v48  ;;  %v2628_v51 = vadd.f32 %v3471_v49, %v2331_v47 }
 0x45a   : > { %v2619_v52 = vpop.f32.mrf.mxu1 }
 0x45b   : > { %2732 = vst [vmem:[%s4341_s16 + $0x190] sm:$0xff] %v2628_v51  ;;  %v2620_v54 = vadd.f32 %v2619_v52, %v2329_v50 }
 0x45c   : > { %v3472_v55 = vpop.f32.mrf.mxu1 }
 0x45d   : > { %2730 = vst [vmem:[%s4341_s16 + $0x180] sm:$0xff] %v2620_v54  ;;  %v2631_v57 = vadd.f32 %v3472_v55, %v2332_v53 }
 0x45e   : > { %v2622_v58 = vpop.f32.mrf.mxu1 }
 0x45f   : > { %2733 = vst [vmem:[%s4341_s16 + $0x198] sm:$0xff] %v2631_v57  ;;  %v2623_v60 = vadd.f32 %v2622_v58, %v2330_v56 }
 0x460   : > { %v3475_v61 = vpop.f32.mrf.mxu1 }
 0x461   : > { %2731 = vst [vmem:[%s4341_s16 + $0x188] sm:$0xff] %v2623_v60  ;;  %v2644_v63 = vadd.f32 %v3475_v61, %v2335_v59 }
 0x462   : > { %v2635_v0 = vpop.f32.mrf.mxu1 }
 0x463   : > { %2736 = vst [vmem:[%s4341_s16 + $0x1b0] sm:$0xff] %v2644_v63  ;;  %v2636_v2 = vadd.f32 %v2635_v0, %v2333_v62 }
 0x464   : > { %v3476_v3 = vpop.f32.mrf.mxu1 }
 0x465   : > { %2734 = vst [vmem:[%s4341_s16 + $0x1a0] sm:$0xff] %v2636_v2  ;;  %v2647_v5 = vadd.f32 %v3476_v3, %v2336_v1 }
 0x466   : > { %v2638_v6 = vpop.f32.mrf.mxu1 }
 0x467   : > { %2737 = vst [vmem:[%s4341_s16 + $0x1b8] sm:$0xff] %v2647_v5  ;;  %v2639_v8 = vadd.f32 %v2638_v6, %v2334_v4 }
 0x468   : > { %v3479_v9 = vpop.f32.mrf.mxu1 }
 0x469   : > { %2735 = vst [vmem:[%s4341_s16 + $0x1a8] sm:$0xff] %v2639_v8  ;;  %v2660_v11 = vadd.f32 %v3479_v9, %v2339_v7 }
 0x46a   : > { %v2651_v12 = vpop.f32.mrf.mxu1 }
 0x46b   : > { %2740 = vst [vmem:[%s4341_s16 + $0x1d0] sm:$0xff] %v2660_v11  ;;  %v2652_v14 = vadd.f32 %v2651_v12, %v2337_v10 }
 0x46c   : > { %v3480_v15 = vpop.f32.mrf.mxu1 }
 0x46d   : > { %2738 = vst [vmem:[%s4341_s16 + $0x1c0] sm:$0xff] %v2652_v14  ;;  %v2663_v17 = vadd.f32 %v3480_v15, %v2340_v13 }
 0x46e   : > { %v2654_v18 = vpop.f32.mrf.mxu1 }
 0x46f   : > { %2741 = vst [vmem:[%s4341_s16 + $0x1d8] sm:$0xff] %v2663_v17  ;;  %v2655_v20 = vadd.f32 %v2654_v18, %v2338_v16 }
 0x470   : > { %v3483_v21 = vpop.f32.mrf.mxu1 }
 0x471   : > { %2739 = vst [vmem:[%s4341_s16 + $0x1c8] sm:$0xff] %v2655_v20  ;;  %v2676_v23 = vadd.f32 %v3483_v21, %v2343_v19 }
 0x472   : > { %v2667_v24 = vpop.f32.mrf.mxu1 }
 0x473   : > { %2744 = vst [vmem:[%s4341_s16 + $0x1f0] sm:$0xff] %v2676_v23  ;;  %v2668_v26 = vadd.f32 %v2667_v24, %v2341_v22 }
 0x474   : > { %v3484_v27 = vpop.f32.mrf.mxu1 }
 0x475   : > { %2742 = vst [vmem:[%s4341_s16 + $0x1e0] sm:$0xff] %v2668_v26  ;;  %v2679_v29 = vadd.f32 %v3484_v27, %v2344_v25 }
 0x476   : > { %v2670_v30 = vpop.f32.mrf.mxu1 }
 0x477   : > { %2745 = vst [vmem:[%s4341_s16 + $0x1f8] sm:$0xff] %v2679_v29  ;;  %v2671_v31 = vadd.f32 %v2670_v30, %v2342_v28 }
 0x479   : > { %2743 = vst [vmem:[%s4341_s16 + $0x1e8] sm:$0xff] %v2671_v31 }
 0x47a   : > { %3931 = shalt.err (!%p3928_p6)
}
 0x47b   : > { %s3932_s3 = scalar_lea.hbm %s4410_s23, 8192  ;;  %s3936_s1 = scalar_lea.hbm %s4466_s9, 16384 }
 0x47c   : > { %p3933_p8 = scmp.ne.s32.totalorder %s4410_s23, %s3932_s3  ;;  %p3937_p11 = scmp.lt.s32.totalorder %s4410_s23, %s4466_s9 }
 0x47d   : > { %p3938_p13 = scmp.lt.s32.totalorder %s3936_s1, %s3932_s3 }
 0x47e   : > { %p3934_p10 = pnand %p3933_p8, %p4499_p5 }
 0x47f   : > { %p3939_p0 = por %p3938_p13, %p3937_p11 }
 0x480   : > { %p3935_p7 = pneg %p3934_p10 }
 0x482   : > { %p3940_p2 = pnand %p3939_p0, %p3935_p7 }
 0x484   : > { %3943 = shalt.err (!%p3940_p2)
}
 0x485   : > { %s4014_s14 = smov 128   ;;  %s4015_s20 = smov 8  }
 0x486   : > { %3519 = dma.vmem_to_hbm [thread:$0]  (%p4499_p5), %s4412_s25, 8192, %s4410_s23, %s2747_s15, %s4014_s14, %s4014_s14, %s4015_s20  }
 0x487 PF: > { %s2775_s17 = sand.u32 1, %s3986_s30   ;;  %p4500_p9 = scmp.ne.s32.totalorder %s4485_s28, 0 }
 0x488   : > { %p4501_p12 = scmp.ge.s32.totalorder %s3998_s12, 2  ;;  %s2776_s27 = scalar_lea.sflag [#allocation4], %s2775_s17 }
 0x48a   : > { %p3551_p1 = pnand %p4501_p12, %p4500_p9 }
 0x48c   : > { %p3552_p3 = pneg %p3551_p1 }
 0x48e   : > { %3981 = dma.done.wait (%p3552_p3), %s2776_s27, 8192  }
 0x48f   : > { %3983 = vsyncadd (%p3552_p3), %s2776_s27, 4294959104  ;;  %p26_p4 = scmp.ge.s32.totalorder %s4207_s22, 4   ;;  %s4502_s30 = smov %s3990_s10 }
 0x490   : > { %s4503_s10 = smov %s3994_s11  ;;  %s4504_s11 = smov %s4218_s18 }
 0x491   : > { %s4505_s12 = smov %s4207_s22  ;;  %28 = sbr.rel (!%p26_p4) target bundleno = 13 (0xd), region = 133 }
 0x496   :  { %2781 = vsyncpa [#allocation3], 1 }
 0x497   :  { %2783 = vsyncpa [#allocation3 + $0x1], 1 }
 0x498   :  { %2784 = vsyncpa [#allocation6], 1 }
 0x499   :  { %2785 = vsyncpa [#allocation9], 1 }
 0x49a   :  { %2786 = vsyncpa [#allocation12], 1 }
 0x49b   :  { %2787 = vsyncpa [#allocation15], 1 }
 0x49c   :  { %2788 = vsyncpa [#allocation4], 1 }
 0x49d   :  { %2790 = vsyncpa [#allocation4 + $0x1], 1 }

</bundles_post_ra>
